<compile_context>
chip_gen: v7x
topology: tpu7x:2x2x1
jax: 0.10.0
libtpu: 0.0.40
codegen_flags: <defaults>
</compile_context>

<pallas_src>
from functools import partial

import jax
import jax.numpy as jnp
from jax.experimental import pallas as pl
from jax.experimental.pallas import tpu as pltpu


def simple_model_kernel(tok_ref, emb_hbm, w_ref, b_ref, out_ref, gather_ref, sem_ref):
    """tok_ref:    SMEM (B, S) int32          (scalar prefetch)
    emb_hbm:    HBM  (V, E)                embedding table (memory_space=ANY)
    w_ref:      VMEM (E, 128) f32          fc weight, transposed + lane-padded
    b_ref:      VMEM (1, 128) f32          lane-padded bias
    out_ref:    VMEM (B_pad, 128) f32      lane/sublane-dense output (sliced outside)
    gather_ref: VMEM (B*S, E)              gathered embedding rows (scratch)
    sem_ref:    DMA semaphores (B*S,)
    """
    B, S = tok_ref.shape                     # small & static (2, 8) -> fully unrolled
    V, E = emb_hbm.shape
    B_pad = out_ref.shape[0]

    # Gather: one row DMA per (b, s) token.  Start ALL copies, then wait, so the
    # HBM fetches overlap instead of serializing.
    copies = []
    for b in range(B):
        for s in range(S):
            i = b * S + s
            tok = jnp.minimum(jnp.maximum(tok_ref[b, s], 0), V - 1)  # guard OOB DMA
            cp = pltpu.make_async_copy(
                emb_hbm.at[pl.ds(tok, 1), :],        # (1, E) row in HBM
                gather_ref.at[pl.ds(i, 1), :],       # (1, E) slot in VMEM
                sem_ref.at[i],
            )
            cp.start()
            copies.append(cp)
    for cp in copies:
        cp.wait()

    # Per-batch mean over S: one cross-sublane reduce per batch row; values stay
    # in registers (no accumulator scratch, no serial add chain).
    parts = []
    for b in range(B):
        rows = gather_ref[pl.ds(b * S, S), :].astype(jnp.float32)    # (S, E)
        parts.append(jnp.sum(rows, axis=0, keepdims=True))           # (1, E)
    if B_pad > B:
        parts.append(jnp.zeros((B_pad - B, E), jnp.float32))
    mean = jnp.concatenate(parts, axis=0) * (1.0 / S)                 # (B_pad, E)

    # Final linear layer on the MXU; unmasked lane-dense (B_pad, 128) store.
    out_ref[...] = (
        jnp.dot(mean, w_ref[...], preferred_element_type=jnp.float32) + b_ref[...]
    )


def prepare_fc_params(fc_w, fc_b, n_pad=128):
    """Pad the (n_out, E) linear layer to a lane-dense (E, 128) slab ONCE at setup."""
    n_out, E = fc_w.shape
    w_pad = jnp.zeros((E, n_pad), jnp.float32).at[:, :n_out].set(
        fc_w.T.astype(jnp.float32))
    b_pad = jnp.zeros((1, n_pad), jnp.float32).at[0, :n_out].set(
        fc_b.astype(jnp.float32))
    return w_pad, b_pad


@partial(jax.jit, static_argnames=("n_out",))
def simple_model_forward(tokens, emb_table, w_pad, b_pad, n_out=2):
    """tokens: (B, S) int; emb_table: (V, E); w_pad: (E, 128); b_pad: (1, 128)."""
    B, S = tokens.shape
    V, E = emb_table.shape
    N_pad = w_pad.shape[1]
    B_pad = max(8, ((B + 7) // 8) * 8)        # sublane-dense output rows

    vmem = pltpu.MemorySpace.VMEM
    out_pad = pl.pallas_call(
        simple_model_kernel,
        out_shape=jax.ShapeDtypeStruct((B_pad, N_pad), jnp.float32),
        grid_spec=pltpu.PrefetchScalarGridSpec(
            num_scalar_prefetch=1,                      # tokens -> SMEM
            grid=(1,),
            in_specs=[
                pl.BlockSpec(memory_space=pl.ANY),      # embedding table stays in HBM
                pl.BlockSpec(memory_space=vmem),        # padded weights (E, 128)
                pl.BlockSpec(memory_space=vmem),        # padded bias (1, 128)
            ],
            out_specs=pl.BlockSpec(memory_space=vmem),
            scratch_shapes=[
                pltpu.VMEM((B * S, E), emb_table.dtype),  # gathered rows (~8 KB)
                pltpu.SemaphoreType.DMA((B * S,)),        # one sem per row DMA
            ],
        ),
        compiler_params=pltpu.CompilerParams(
            dimension_semantics=("arbitrary",),
        ),
    )(tokens.astype(jnp.int32), emb_table, w_pad, b_pad)

    return out_pad[:B, :n_out]


if __name__ == "__main__":
    VOCAB_SIZE = 1000
    EMBED_SIZE = 128
    BATCH = 2
    SEQ = 8

    key = jax.random.PRNGKey(0)
    k_tok, k_emb, k_w, k_b = jax.random.split(key, 4)

    # Deterministic parameter init (mirrors PyTorch init styles, synthetic values).
    emb_table = jax.random.normal(k_emb, (VOCAB_SIZE, EMBED_SIZE), jnp.float32)
    bound = 1.0 / (EMBED_SIZE ** 0.5)
    fc_w = jax.random.uniform(k_w, (2, EMBED_SIZE), jnp.float32, -bound, bound)
    fc_b = jax.random.uniform(k_b, (2,), jnp.float32, -bound, bound)

    tokens = jax.random.randint(k_tok, (BATCH, SEQ), 0, VOCAB_SIZE, jnp.int32)

    # Model "setup": pad the linear layer once, outside the forward path.
    w_pad, b_pad = prepare_fc_params(fc_w, fc_b)

    out = simple_model_forward(tokens, emb_table, w_pad, b_pad, n_out=2)
    out = jax.block_until_ready(out)

    # Reference check in plain JAX (same math as the PyTorch forward).
    ref = emb_table[tokens].mean(axis=1) @ fc_w.T + fc_b
    assert out.shape == (BATCH, 2)
    assert jnp.allclose(out, ref, atol=1e-4, rtol=1e-4), "mismatch vs reference"

    print("KERNEL_OK")
</pallas_src>

<mosaic_0001>
module attributes {stable_mosaic.version = 11 : i64} {
  func.func @simple_model_kernel(%arg0: i32, %arg1: memref<2x8xi32, #tpu.memory_space<smem>>, %arg2: memref<1000x128xf32, #tpu.memory_space<any>>, %arg3: memref<128x128xf32, #tpu.memory_space<vmem>>, %arg4: memref<1x128xf32, #tpu.memory_space<vmem>>, %arg5: memref<8x128xf32, #tpu.memory_space<vmem>>, %arg6: memref<16x128xf32, #tpu.memory_space<vmem>>, %arg7: memref<16x!tpu.dma_semaphore, #tpu.memory_space<semaphore_mem>>) attributes {dimension_semantics = [#tpu.dimension_semantics<arbitrary>], iteration_bounds = array<i64: 1>, scalar_prefetch = 1 : i64, scratch_operands = 2 : i64, tpu.core_type = #tpu.core_type<tc>, window_params = [{}, {pipeline_mode = #tpu.pipeline_mode<synchronous>, transform_indices = @transform_1, window_bounds = array<i64: 128, 128>}, {pipeline_mode = #tpu.pipeline_mode<synchronous>, transform_indices = @transform_2, window_bounds = array<i64: 1, 128>}, {pipeline_mode = #tpu.pipeline_mode<synchronous>, transform_indices = @transform_3, window_bounds = array<i64: 8, 128>}]} {
    %c0 = arith.constant 0 : index
    %c0_0 = arith.constant 0 : index
    %0 = memref.load %arg1[%c0, %c0_0] : memref<2x8xi32, #tpu.memory_space<smem>>
    %c0_i32 = arith.constant 0 : i32
    %1 = arith.maxsi %0, %c0_i32 : i32
    %c999_i32 = arith.constant 999 : i32
    %2 = arith.minsi %1, %c999_i32 : i32
    %c0_i32_1 = arith.constant 0 : i32
    %c0_i32_2 = arith.constant 0 : i32
    %3 = tpu.memref_slice %arg2[%2, %c0_i32_2] : memref<1000x128xf32, #tpu.memory_space<any>> -> memref<1x128xf32, #tpu.memory_space<any>>
    %c0_i32_3 = arith.constant 0 : i32
    %c0_i32_4 = arith.constant 0 : i32
    %4 = tpu.memref_slice %arg6[%c0_i32_3, %c0_i32_4] : memref<16x128xf32, #tpu.memory_space<vmem>> -> memref<1x128xf32, #tpu.memory_space<vmem>>
    %5 = tpu.memref_slice %arg7[%c0_i32_1] : memref<16x!tpu.dma_semaphore, #tpu.memory_space<semaphore_mem>> -> memref<1x!tpu.dma_semaphore, #tpu.memory_space<semaphore_mem>>
    %6 = tpu.memref_squeeze %5 : memref<1x!tpu.dma_semaphore, #tpu.memory_space<semaphore_mem>> -> memref<!tpu.dma_semaphore, #tpu.memory_space<semaphore_mem>>
    tpu.enqueue_dma source(%3 : memref<1x128xf32, #tpu.memory_space<any>>) target(%4 : memref<1x128xf32, #tpu.memory_space<vmem>>) target_semaphore(%6 : memref<!tpu.dma_semaphore, #tpu.memory_space<semaphore_mem>>)
    %c0_5 = arith.constant 0 : index
    %c1 = arith.constant 1 : index
    %7 = memref.load %arg1[%c0_5, %c1] : memref<2x8xi32, #tpu.memory_space<smem>>
    %c0_i32_6 = arith.constant 0 : i32
    %8 = arith.maxsi %7, %c0_i32_6 : i32
    %c999_i32_7 = arith.constant 999 : i32
    %9 = arith.minsi %8, %c999_i32_7 : i32
    %c1_i32 = arith.constant 1 : i32
    %c0_i32_8 = arith.constant 0 : i32
    %10 = tpu.memref_slice %arg2[%9, %c0_i32_8] : memref<1000x128xf32, #tpu.memory_space<any>> -> memref<1x128xf32, #tpu.memory_space<any>>
    %c1_i32_9 = arith.constant 1 : i32
    %c0_i32_10 = arith.constant 0 : i32
    %11 = tpu.memref_slice %arg6[%c1_i32_9, %c0_i32_10] : memref<16x128xf32, #tpu.memory_space<vmem>> -> memref<1x128xf32, #tpu.memory_space<vmem>>
    %12 = tpu.memref_slice %arg7[%c1_i32] : memref<16x!tpu.dma_semaphore, #tpu.memory_space<semaphore_mem>> -> memref<1x!tpu.dma_semaphore, #tpu.memory_space<semaphore_mem>>
    %13 = tpu.memref_squeeze %12 : memref<1x!tpu.dma_semaphore, #tpu.memory_space<semaphore_mem>> -> memref<!tpu.dma_semaphore, #tpu.memory_space<semaphore_mem>>
    tpu.enqueue_dma source(%10 : memref<1x128xf32, #tpu.memory_space<any>>) target(%11 : memref<1x128xf32, #tpu.memory_space<vmem>>) target_semaphore(%13 : memref<!tpu.dma_semaphore, #tpu.memory_space<semaphore_mem>>)
    %c0_11 = arith.constant 0 : index
    %c2 = arith.constant 2 : index
    %14 = memref.load %arg1[%c0_11, %c2] : memref<2x8xi32, #tpu.memory_space<smem>>
    %c0_i32_12 = arith.constant 0 : i32
    %15 = arith.maxsi %14, %c0_i32_12 : i32
    %c999_i32_13 = arith.constant 999 : i32
    %16 = arith.minsi %15, %c999_i32_13 : i32
    %c2_i32 = arith.constant 2 : i32
    %c0_i32_14 = arith.constant 0 : i32
    %17 = tpu.memref_slice %arg2[%16, %c0_i32_14] : memref<1000x128xf32, #tpu.memory_space<any>> -> memref<1x128xf32, #tpu.memory_space<any>>
    %c2_i32_15 = arith.constant 2 : i32
    %c0_i32_16 = arith.constant 0 : i32
    %18 = tpu.memref_slice %arg6[%c2_i32_15, %c0_i32_16] : memref<16x128xf32, #tpu.memory_space<vmem>> -> memref<1x128xf32, #tpu.memory_space<vmem>>
    %19 = tpu.memref_slice %arg7[%c2_i32] : memref<16x!tpu.dma_semaphore, #tpu.memory_space<semaphore_mem>> -> memref<1x!tpu.dma_semaphore, #tpu.memory_space<semaphore_mem>>
    %20 = tpu.memref_squeeze %19 : memref<1x!tpu.dma_semaphore, #tpu.memory_space<semaphore_mem>> -> memref<!tpu.dma_semaphore, #tpu.memory_space<semaphore_mem>>
    tpu.enqueue_dma source(%17 : memref<1x128xf32, #tpu.memory_space<any>>) target(%18 : memref<1x128xf32, #tpu.memory_space<vmem>>) target_semaphore(%20 : memref<!tpu.dma_semaphore, #tpu.memory_space<semaphore_mem>>)
    %c0_17 = arith.constant 0 : index
    %c3 = arith.constant 3 : index
    %21 = memref.load %arg1[%c0_17, %c3] : memref<2x8xi32, #tpu.memory_space<smem>>
    %c0_i32_18 = arith.constant 0 : i32
    %22 = arith.maxsi %21, %c0_i32_18 : i32
    %c999_i32_19 = arith.constant 999 : i32
    %23 = arith.minsi %22, %c999_i32_19 : i32
    %c3_i32 = arith.constant 3 : i32
    %c0_i32_20 = arith.constant 0 : i32
    %24 = tpu.memref_slice %arg2[%23, %c0_i32_20] : memref<1000x128xf32, #tpu.memory_space<any>> -> memref<1x128xf32, #tpu.memory_space<any>>
    %c3_i32_21 = arith.constant 3 : i32
    %c0_i32_22 = arith.constant 0 : i32
    %25 = tpu.memref_slice %arg6[%c3_i32_21, %c0_i32_22] : memref<16x128xf32, #tpu.memory_space<vmem>> -> memref<1x128xf32, #tpu.memory_space<vmem>>
    %26 = tpu.memref_slice %arg7[%c3_i32] : memref<16x!tpu.dma_semaphore, #tpu.memory_space<semaphore_mem>> -> memref<1x!tpu.dma_semaphore, #tpu.memory_space<semaphore_mem>>
    %27 = tpu.memref_squeeze %26 : memref<1x!tpu.dma_semaphore, #tpu.memory_space<semaphore_mem>> -> memref<!tpu.dma_semaphore, #tpu.memory_space<semaphore_mem>>
    tpu.enqueue_dma source(%24 : memref<1x128xf32, #tpu.memory_space<any>>) target(%25 : memref<1x128xf32, #tpu.memory_space<vmem>>) target_semaphore(%27 : memref<!tpu.dma_semaphore, #tpu.memory_space<semaphore_mem>>)
    %c0_23 = arith.constant 0 : index
    %c4 = arith.constant 4 : index
    %28 = memref.load %arg1[%c0_23, %c4] : memref<2x8xi32, #tpu.memory_space<smem>>
    %c0_i32_24 = arith.constant 0 : i32
    %29 = arith.maxsi %28, %c0_i32_24 : i32
    %c999_i32_25 = arith.constant 999 : i32
    %30 = arith.minsi %29, %c999_i32_25 : i32
    %c4_i32 = arith.constant 4 : i32
    %c0_i32_26 = arith.constant 0 : i32
    %31 = tpu.memref_slice %arg2[%30, %c0_i32_26] : memref<1000x128xf32, #tpu.memory_space<any>> -> memref<1x128xf32, #tpu.memory_space<any>>
    %c4_i32_27 = arith.constant 4 : i32
    %c0_i32_28 = arith.constant 0 : i32
    %32 = tpu.memref_slice %arg6[%c4_i32_27, %c0_i32_28] : memref<16x128xf32, #tpu.memory_space<vmem>> -> memref<1x128xf32, #tpu.memory_space<vmem>>
    %33 = tpu.memref_slice %arg7[%c4_i32] : memref<16x!tpu.dma_semaphore, #tpu.memory_space<semaphore_mem>> -> memref<1x!tpu.dma_semaphore, #tpu.memory_space<semaphore_mem>>
    %34 = tpu.memref_squeeze %33 : memref<1x!tpu.dma_semaphore, #tpu.memory_space<semaphore_mem>> -> memref<!tpu.dma_semaphore, #tpu.memory_space<semaphore_mem>>
    tpu.enqueue_dma source(%31 : memref<1x128xf32, #tpu.memory_space<any>>) target(%32 : memref<1x128xf32, #tpu.memory_space<vmem>>) target_semaphore(%34 : memref<!tpu.dma_semaphore, #tpu.memory_space<semaphore_mem>>)
    %c0_29 = arith.constant 0 : index
    %c5 = arith.constant 5 : index
    %35 = memref.load %arg1[%c0_29, %c5] : memref<2x8xi32, #tpu.memory_space<smem>>
    %c0_i32_30 = arith.constant 0 : i32
    %36 = arith.maxsi %35, %c0_i32_30 : i32
    %c999_i32_31 = arith.constant 999 : i32
    %37 = arith.minsi %36, %c999_i32_31 : i32
    %c5_i32 = arith.constant 5 : i32
    %c0_i32_32 = arith.constant 0 : i32
    %38 = tpu.memref_slice %arg2[%37, %c0_i32_32] : memref<1000x128xf32, #tpu.memory_space<any>> -> memref<1x128xf32, #tpu.memory_space<any>>
    %c5_i32_33 = arith.constant 5 : i32
    %c0_i32_34 = arith.constant 0 : i32
    %39 = tpu.memref_slice %arg6[%c5_i32_33, %c0_i32_34] : memref<16x128xf32, #tpu.memory_space<vmem>> -> memref<1x128xf32, #tpu.memory_space<vmem>>
    %40 = tpu.memref_slice %arg7[%c5_i32] : memref<16x!tpu.dma_semaphore, #tpu.memory_space<semaphore_mem>> -> memref<1x!tpu.dma_semaphore, #tpu.memory_space<semaphore_mem>>
    %41 = tpu.memref_squeeze %40 : memref<1x!tpu.dma_semaphore, #tpu.memory_space<semaphore_mem>> -> memref<!tpu.dma_semaphore, #tpu.memory_space<semaphore_mem>>
    tpu.enqueue_dma source(%38 : memref<1x128xf32, #tpu.memory_space<any>>) target(%39 : memref<1x128xf32, #tpu.memory_space<vmem>>) target_semaphore(%41 : memref<!tpu.dma_semaphore, #tpu.memory_space<semaphore_mem>>)
    %c0_35 = arith.constant 0 : index
    %c6 = arith.constant 6 : index
    %42 = memref.load %arg1[%c0_35, %c6] : memref<2x8xi32, #tpu.memory_space<smem>>
    %c0_i32_36 = arith.constant 0 : i32
    %43 = arith.maxsi %42, %c0_i32_36 : i32
    %c999_i32_37 = arith.constant 999 : i32
    %44 = arith.minsi %43, %c999_i32_37 : i32
    %c6_i32 = arith.constant 6 : i32
    %c0_i32_38 = arith.constant 0 : i32
    %45 = tpu.memref_slice %arg2[%44, %c0_i32_38] : memref<1000x128xf32, #tpu.memory_space<any>> -> memref<1x128xf32, #tpu.memory_space<any>>
    %c6_i32_39 = arith.constant 6 : i32
    %c0_i32_40 = arith.constant 0 : i32
    %46 = tpu.memref_slice %arg6[%c6_i32_39, %c0_i32_40] : memref<16x128xf32, #tpu.memory_space<vmem>> -> memref<1x128xf32, #tpu.memory_space<vmem>>
    %47 = tpu.memref_slice %arg7[%c6_i32] : memref<16x!tpu.dma_semaphore, #tpu.memory_space<semaphore_mem>> -> memref<1x!tpu.dma_semaphore, #tpu.memory_space<semaphore_mem>>
    %48 = tpu.memref_squeeze %47 : memref<1x!tpu.dma_semaphore, #tpu.memory_space<semaphore_mem>> -> memref<!tpu.dma_semaphore, #tpu.memory_space<semaphore_mem>>
    tpu.enqueue_dma source(%45 : memref<1x128xf32, #tpu.memory_space<any>>) target(%46 : memref<1x128xf32, #tpu.memory_space<vmem>>) target_semaphore(%48 : memref<!tpu.dma_semaphore, #tpu.memory_space<semaphore_mem>>)
    %c0_41 = arith.constant 0 : index
    %c7 = arith.constant 7 : index
    %49 = memref.load %arg1[%c0_41, %c7] : memref<2x8xi32, #tpu.memory_space<smem>>
    %c0_i32_42 = arith.constant 0 : i32
    %50 = arith.maxsi %49, %c0_i32_42 : i32
    %c999_i32_43 = arith.constant 999 : i32
    %51 = arith.minsi %50, %c999_i32_43 : i32
    %c7_i32 = arith.constant 7 : i32
    %c0_i32_44 = arith.constant 0 : i32
    %52 = tpu.memref_slice %arg2[%51, %c0_i32_44] : memref<1000x128xf32, #tpu.memory_space<any>> -> memref<1x128xf32, #tpu.memory_space<any>>
    %c7_i32_45 = arith.constant 7 : i32
    %c0_i32_46 = arith.constant 0 : i32
    %53 = tpu.memref_slice %arg6[%c7_i32_45, %c0_i32_46] : memref<16x128xf32, #tpu.memory_space<vmem>> -> memref<1x128xf32, #tpu.memory_space<vmem>>
    %54 = tpu.memref_slice %arg7[%c7_i32] : memref<16x!tpu.dma_semaphore, #tpu.memory_space<semaphore_mem>> -> memref<1x!tpu.dma_semaphore, #tpu.memory_space<semaphore_mem>>
    %55 = tpu.memref_squeeze %54 : memref<1x!tpu.dma_semaphore, #tpu.memory_space<semaphore_mem>> -> memref<!tpu.dma_semaphore, #tpu.memory_space<semaphore_mem>>
    tpu.enqueue_dma source(%52 : memref<1x128xf32, #tpu.memory_space<any>>) target(%53 : memref<1x128xf32, #tpu.memory_space<vmem>>) target_semaphore(%55 : memref<!tpu.dma_semaphore, #tpu.memory_space<semaphore_mem>>)
    %c1_47 = arith.constant 1 : index
    %c0_48 = arith.constant 0 : index
    %56 = memref.load %arg1[%c1_47, %c0_48] : memref<2x8xi32, #tpu.memory_space<smem>>
    %c0_i32_49 = arith.constant 0 : i32
    %57 = arith.maxsi %56, %c0_i32_49 : i32
    %c999_i32_50 = arith.constant 999 : i32
    %58 = arith.minsi %57, %c999_i32_50 : i32
    %c8_i32 = arith.constant 8 : i32
    %c0_i32_51 = arith.constant 0 : i32
    %59 = tpu.memref_slice %arg2[%58, %c0_i32_51] : memref<1000x128xf32, #tpu.memory_space<any>> -> memref<1x128xf32, #tpu.memory_space<any>>
    %c8_i32_52 = arith.constant 8 : i32
    %c0_i32_53 = arith.constant 0 : i32
    %60 = tpu.memref_slice %arg6[%c8_i32_52, %c0_i32_53] : memref<16x128xf32, #tpu.memory_space<vmem>> -> memref<1x128xf32, #tpu.memory_space<vmem>>
    %61 = tpu.memref_slice %arg7[%c8_i32] : memref<16x!tpu.dma_semaphore, #tpu.memory_space<semaphore_mem>> -> memref<1x!tpu.dma_semaphore, #tpu.memory_space<semaphore_mem>>
    %62 = tpu.memref_squeeze %61 : memref<1x!tpu.dma_semaphore, #tpu.memory_space<semaphore_mem>> -> memref<!tpu.dma_semaphore, #tpu.memory_space<semaphore_mem>>
    tpu.enqueue_dma source(%59 : memref<1x128xf32, #tpu.memory_space<any>>) target(%60 : memref<1x128xf32, #tpu.memory_space<vmem>>) target_semaphore(%62 : memref<!tpu.dma_semaphore, #tpu.memory_space<semaphore_mem>>)
    %c1_54 = arith.constant 1 : index
    %c1_55 = arith.constant 1 : index
    %63 = memref.load %arg1[%c1_54, %c1_55] : memref<2x8xi32, #tpu.memory_space<smem>>
    %c0_i32_56 = arith.constant 0 : i32
    %64 = arith.maxsi %63, %c0_i32_56 : i32
    %c999_i32_57 = arith.constant 999 : i32
    %65 = arith.minsi %64, %c999_i32_57 : i32
    %c9_i32 = arith.constant 9 : i32
    %c0_i32_58 = arith.constant 0 : i32
    %66 = tpu.memref_slice %arg2[%65, %c0_i32_58] : memref<1000x128xf32, #tpu.memory_space<any>> -> memref<1x128xf32, #tpu.memory_space<any>>
    %c9_i32_59 = arith.constant 9 : i32
    %c0_i32_60 = arith.constant 0 : i32
    %67 = tpu.memref_slice %arg6[%c9_i32_59, %c0_i32_60] : memref<16x128xf32, #tpu.memory_space<vmem>> -> memref<1x128xf32, #tpu.memory_space<vmem>>
    %68 = tpu.memref_slice %arg7[%c9_i32] : memref<16x!tpu.dma_semaphore, #tpu.memory_space<semaphore_mem>> -> memref<1x!tpu.dma_semaphore, #tpu.memory_space<semaphore_mem>>
    %69 = tpu.memref_squeeze %68 : memref<1x!tpu.dma_semaphore, #tpu.memory_space<semaphore_mem>> -> memref<!tpu.dma_semaphore, #tpu.memory_space<semaphore_mem>>
    tpu.enqueue_dma source(%66 : memref<1x128xf32, #tpu.memory_space<any>>) target(%67 : memref<1x128xf32, #tpu.memory_space<vmem>>) target_semaphore(%69 : memref<!tpu.dma_semaphore, #tpu.memory_space<semaphore_mem>>)
    %c1_61 = arith.constant 1 : index
    %c2_62 = arith.constant 2 : index
    %70 = memref.load %arg1[%c1_61, %c2_62] : memref<2x8xi32, #tpu.memory_space<smem>>
    %c0_i32_63 = arith.constant 0 : i32
    %71 = arith.maxsi %70, %c0_i32_63 : i32
    %c999_i32_64 = arith.constant 999 : i32
    %72 = arith.minsi %71, %c999_i32_64 : i32
    %c10_i32 = arith.constant 10 : i32
    %c0_i32_65 = arith.constant 0 : i32
    %73 = tpu.memref_slice %arg2[%72, %c0_i32_65] : memref<1000x128xf32, #tpu.memory_space<any>> -> memref<1x128xf32, #tpu.memory_space<any>>
    %c10_i32_66 = arith.constant 10 : i32
    %c0_i32_67 = arith.constant 0 : i32
    %74 = tpu.memref_slice %arg6[%c10_i32_66, %c0_i32_67] : memref<16x128xf32, #tpu.memory_space<vmem>> -> memref<1x128xf32, #tpu.memory_space<vmem>>
    %75 = tpu.memref_slice %arg7[%c10_i32] : memref<16x!tpu.dma_semaphore, #tpu.memory_space<semaphore_mem>> -> memref<1x!tpu.dma_semaphore, #tpu.memory_space<semaphore_mem>>
    %76 = tpu.memref_squeeze %75 : memref<1x!tpu.dma_semaphore, #tpu.memory_space<semaphore_mem>> -> memref<!tpu.dma_semaphore, #tpu.memory_space<semaphore_mem>>
    tpu.enqueue_dma source(%73 : memref<1x128xf32, #tpu.memory_space<any>>) target(%74 : memref<1x128xf32, #tpu.memory_space<vmem>>) target_semaphore(%76 : memref<!tpu.dma_semaphore, #tpu.memory_space<semaphore_mem>>)
    %c1_68 = arith.constant 1 : index
    %c3_69 = arith.constant 3 : index
    %77 = memref.load %arg1[%c1_68, %c3_69] : memref<2x8xi32, #tpu.memory_space<smem>>
    %c0_i32_70 = arith.constant 0 : i32
    %78 = arith.maxsi %77, %c0_i32_70 : i32
    %c999_i32_71 = arith.constant 999 : i32
    %79 = arith.minsi %78, %c999_i32_71 : i32
    %c11_i32 = arith.constant 11 : i32
    %c0_i32_72 = arith.constant 0 : i32
    %80 = tpu.memref_slice %arg2[%79, %c0_i32_72] : memref<1000x128xf32, #tpu.memory_space<any>> -> memref<1x128xf32, #tpu.memory_space<any>>
    %c11_i32_73 = arith.constant 11 : i32
    %c0_i32_74 = arith.constant 0 : i32
    %81 = tpu.memref_slice %arg6[%c11_i32_73, %c0_i32_74] : memref<16x128xf32, #tpu.memory_space<vmem>> -> memref<1x128xf32, #tpu.memory_space<vmem>>
    %82 = tpu.memref_slice %arg7[%c11_i32] : memref<16x!tpu.dma_semaphore, #tpu.memory_space<semaphore_mem>> -> memref<1x!tpu.dma_semaphore, #tpu.memory_space<semaphore_mem>>
    %83 = tpu.memref_squeeze %82 : memref<1x!tpu.dma_semaphore, #tpu.memory_space<semaphore_mem>> -> memref<!tpu.dma_semaphore, #tpu.memory_space<semaphore_mem>>
    tpu.enqueue_dma source(%80 : memref<1x128xf32, #tpu.memory_space<any>>) target(%81 : memref<1x128xf32, #tpu.memory_space<vmem>>) target_semaphore(%83 : memref<!tpu.dma_semaphore, #tpu.memory_space<semaphore_mem>>)
    %c1_75 = arith.constant 1 : index
    %c4_76 = arith.constant 4 : index
    %84 = memref.load %arg1[%c1_75, %c4_76] : memref<2x8xi32, #tpu.memory_space<smem>>
    %c0_i32_77 = arith.constant 0 : i32
    %85 = arith.maxsi %84, %c0_i32_77 : i32
    %c999_i32_78 = arith.constant 999 : i32
    %86 = arith.minsi %85, %c999_i32_78 : i32
    %c12_i32 = arith.constant 12 : i32
    %c0_i32_79 = arith.constant 0 : i32
    %87 = tpu.memref_slice %arg2[%86, %c0_i32_79] : memref<1000x128xf32, #tpu.memory_space<any>> -> memref<1x128xf32, #tpu.memory_space<any>>
    %c12_i32_80 = arith.constant 12 : i32
    %c0_i32_81 = arith.constant 0 : i32
    %88 = tpu.memref_slice %arg6[%c12_i32_80, %c0_i32_81] : memref<16x128xf32, #tpu.memory_space<vmem>> -> memref<1x128xf32, #tpu.memory_space<vmem>>
    %89 = tpu.memref_slice %arg7[%c12_i32] : memref<16x!tpu.dma_semaphore, #tpu.memory_space<semaphore_mem>> -> memref<1x!tpu.dma_semaphore, #tpu.memory_space<semaphore_mem>>
    %90 = tpu.memref_squeeze %89 : memref<1x!tpu.dma_semaphore, #tpu.memory_space<semaphore_mem>> -> memref<!tpu.dma_semaphore, #tpu.memory_space<semaphore_mem>>
    tpu.enqueue_dma source(%87 : memref<1x128xf32, #tpu.memory_space<any>>) target(%88 : memref<1x128xf32, #tpu.memory_space<vmem>>) target_semaphore(%90 : memref<!tpu.dma_semaphore, #tpu.memory_space<semaphore_mem>>)
    %c1_82 = arith.constant 1 : index
    %c5_83 = arith.constant 5 : index
    %91 = memref.load %arg1[%c1_82, %c5_83] : memref<2x8xi32, #tpu.memory_space<smem>>
    %c0_i32_84 = arith.constant 0 : i32
    %92 = arith.maxsi %91, %c0_i32_84 : i32
    %c999_i32_85 = arith.constant 999 : i32
    %93 = arith.minsi %92, %c999_i32_85 : i32
    %c13_i32 = arith.constant 13 : i32
    %c0_i32_86 = arith.constant 0 : i32
    %94 = tpu.memref_slice %arg2[%93, %c0_i32_86] : memref<1000x128xf32, #tpu.memory_space<any>> -> memref<1x128xf32, #tpu.memory_space<any>>
    %c13_i32_87 = arith.constant 13 : i32
    %c0_i32_88 = arith.constant 0 : i32
    %95 = tpu.memref_slice %arg6[%c13_i32_87, %c0_i32_88] : memref<16x128xf32, #tpu.memory_space<vmem>> -> memref<1x128xf32, #tpu.memory_space<vmem>>
    %96 = tpu.memref_slice %arg7[%c13_i32] : memref<16x!tpu.dma_semaphore, #tpu.memory_space<semaphore_mem>> -> memref<1x!tpu.dma_semaphore, #tpu.memory_space<semaphore_mem>>
    %97 = tpu.memref_squeeze %96 : memref<1x!tpu.dma_semaphore, #tpu.memory_space<semaphore_mem>> -> memref<!tpu.dma_semaphore, #tpu.memory_space<semaphore_mem>>
    tpu.enqueue_dma source(%94 : memref<1x128xf32, #tpu.memory_space<any>>) target(%95 : memref<1x128xf32, #tpu.memory_space<vmem>>) target_semaphore(%97 : memref<!tpu.dma_semaphore, #tpu.memory_space<semaphore_mem>>)
    %c1_89 = arith.constant 1 : index
    %c6_90 = arith.constant 6 : index
    %98 = memref.load %arg1[%c1_89, %c6_90] : memref<2x8xi32, #tpu.memory_space<smem>>
    %c0_i32_91 = arith.constant 0 : i32
    %99 = arith.maxsi %98, %c0_i32_91 : i32
    %c999_i32_92 = arith.constant 999 : i32
    %100 = arith.minsi %99, %c999_i32_92 : i32
    %c14_i32 = arith.constant 14 : i32
    %c0_i32_93 = arith.constant 0 : i32
    %101 = tpu.memref_slice %arg2[%100, %c0_i32_93] : memref<1000x128xf32, #tpu.memory_space<any>> -> memref<1x128xf32, #tpu.memory_space<any>>
    %c14_i32_94 = arith.constant 14 : i32
    %c0_i32_95 = arith.constant 0 : i32
    %102 = tpu.memref_slice %arg6[%c14_i32_94, %c0_i32_95] : memref<16x128xf32, #tpu.memory_space<vmem>> -> memref<1x128xf32, #tpu.memory_space<vmem>>
    %103 = tpu.memref_slice %arg7[%c14_i32] : memref<16x!tpu.dma_semaphore, #tpu.memory_space<semaphore_mem>> -> memref<1x!tpu.dma_semaphore, #tpu.memory_space<semaphore_mem>>
    %104 = tpu.memref_squeeze %103 : memref<1x!tpu.dma_semaphore, #tpu.memory_space<semaphore_mem>> -> memref<!tpu.dma_semaphore, #tpu.memory_space<semaphore_mem>>
    tpu.enqueue_dma source(%101 : memref<1x128xf32, #tpu.memory_space<any>>) target(%102 : memref<1x128xf32, #tpu.memory_space<vmem>>) target_semaphore(%104 : memref<!tpu.dma_semaphore, #tpu.memory_space<semaphore_mem>>)
    %c1_96 = arith.constant 1 : index
    %c7_97 = arith.constant 7 : index
    %105 = memref.load %arg1[%c1_96, %c7_97] : memref<2x8xi32, #tpu.memory_space<smem>>
    %c0_i32_98 = arith.constant 0 : i32
    %106 = arith.maxsi %105, %c0_i32_98 : i32
    %c999_i32_99 = arith.constant 999 : i32
    %107 = arith.minsi %106, %c999_i32_99 : i32
    %c15_i32 = arith.constant 15 : i32
    %c0_i32_100 = arith.constant 0 : i32
    %108 = tpu.memref_slice %arg2[%107, %c0_i32_100] : memref<1000x128xf32, #tpu.memory_space<any>> -> memref<1x128xf32, #tpu.memory_space<any>>
    %c15_i32_101 = arith.constant 15 : i32
    %c0_i32_102 = arith.constant 0 : i32
    %109 = tpu.memref_slice %arg6[%c15_i32_101, %c0_i32_102] : memref<16x128xf32, #tpu.memory_space<vmem>> -> memref<1x128xf32, #tpu.memory_space<vmem>>
    %110 = tpu.memref_slice %arg7[%c15_i32] : memref<16x!tpu.dma_semaphore, #tpu.memory_space<semaphore_mem>> -> memref<1x!tpu.dma_semaphore, #tpu.memory_space<semaphore_mem>>
    %111 = tpu.memref_squeeze %110 : memref<1x!tpu.dma_semaphore, #tpu.memory_space<semaphore_mem>> -> memref<!tpu.dma_semaphore, #tpu.memory_space<semaphore_mem>>
    tpu.enqueue_dma source(%108 : memref<1x128xf32, #tpu.memory_space<any>>) target(%109 : memref<1x128xf32, #tpu.memory_space<vmem>>) target_semaphore(%111 : memref<!tpu.dma_semaphore, #tpu.memory_space<semaphore_mem>>)
    %c0_i32_103 = arith.constant 0 : i32
    %c0_i32_104 = arith.constant 0 : i32
    %112 = tpu.memref_slice %arg2[%2, %c0_i32_104] : memref<1000x128xf32, #tpu.memory_space<any>> -> memref<1x128xf32, #tpu.memory_space<any>>
    %c0_i32_105 = arith.constant 0 : i32
    %c0_i32_106 = arith.constant 0 : i32
    %113 = tpu.memref_slice %arg6[%c0_i32_105, %c0_i32_106] : memref<16x128xf32, #tpu.memory_space<vmem>> -> memref<1x128xf32, #tpu.memory_space<vmem>>
    %114 = tpu.memref_slice %arg7[%c0_i32_103] : memref<16x!tpu.dma_semaphore, #tpu.memory_space<semaphore_mem>> -> memref<1x!tpu.dma_semaphore, #tpu.memory_space<semaphore_mem>>
    %115 = tpu.memref_squeeze %114 : memref<1x!tpu.dma_semaphore, #tpu.memory_space<semaphore_mem>> -> memref<!tpu.dma_semaphore, #tpu.memory_space<semaphore_mem>>
    tpu.wait_dma2 semaphore(%115 : memref<!tpu.dma_semaphore, #tpu.memory_space<semaphore_mem>>) src(%112 : memref<1x128xf32, #tpu.memory_space<any>>) dst(%113 : memref<1x128xf32, #tpu.memory_space<vmem>>)
    %c1_i32_107 = arith.constant 1 : i32
    %c0_i32_108 = arith.constant 0 : i32
    %116 = tpu.memref_slice %arg2[%9, %c0_i32_108] : memref<1000x128xf32, #tpu.memory_space<any>> -> memref<1x128xf32, #tpu.memory_space<any>>
    %c1_i32_109 = arith.constant 1 : i32
    %c0_i32_110 = arith.constant 0 : i32
    %117 = tpu.memref_slice %arg6[%c1_i32_109, %c0_i32_110] : memref<16x128xf32, #tpu.memory_space<vmem>> -> memref<1x128xf32, #tpu.memory_space<vmem>>
    %118 = tpu.memref_slice %arg7[%c1_i32_107] : memref<16x!tpu.dma_semaphore, #tpu.memory_space<semaphore_mem>> -> memref<1x!tpu.dma_semaphore, #tpu.memory_space<semaphore_mem>>
    %119 = tpu.memref_squeeze %118 : memref<1x!tpu.dma_semaphore, #tpu.memory_space<semaphore_mem>> -> memref<!tpu.dma_semaphore, #tpu.memory_space<semaphore_mem>>
    tpu.wait_dma2 semaphore(%119 : memref<!tpu.dma_semaphore, #tpu.memory_space<semaphore_mem>>) src(%116 : memref<1x128xf32, #tpu.memory_space<any>>) dst(%117 : memref<1x128xf32, #tpu.memory_space<vmem>>)
    %c2_i32_111 = arith.constant 2 : i32
    %c0_i32_112 = arith.constant 0 : i32
    %120 = tpu.memref_slice %arg2[%16, %c0_i32_112] : memref<1000x128xf32, #tpu.memory_space<any>> -> memref<1x128xf32, #tpu.memory_space<any>>
    %c2_i32_113 = arith.constant 2 : i32
    %c0_i32_114 = arith.constant 0 : i32
    %121 = tpu.memref_slice %arg6[%c2_i32_113, %c0_i32_114] : memref<16x128xf32, #tpu.memory_space<vmem>> -> memref<1x128xf32, #tpu.memory_space<vmem>>
    %122 = tpu.memref_slice %arg7[%c2_i32_111] : memref<16x!tpu.dma_semaphore, #tpu.memory_space<semaphore_mem>> -> memref<1x!tpu.dma_semaphore, #tpu.memory_space<semaphore_mem>>
    %123 = tpu.memref_squeeze %122 : memref<1x!tpu.dma_semaphore, #tpu.memory_space<semaphore_mem>> -> memref<!tpu.dma_semaphore, #tpu.memory_space<semaphore_mem>>
    tpu.wait_dma2 semaphore(%123 : memref<!tpu.dma_semaphore, #tpu.memory_space<semaphore_mem>>) src(%120 : memref<1x128xf32, #tpu.memory_space<any>>) dst(%121 : memref<1x128xf32, #tpu.memory_space<vmem>>)
    %c3_i32_115 = arith.constant 3 : i32
    %c0_i32_116 = arith.constant 0 : i32
    %124 = tpu.memref_slice %arg2[%23, %c0_i32_116] : memref<1000x128xf32, #tpu.memory_space<any>> -> memref<1x128xf32, #tpu.memory_space<any>>
    %c3_i32_117 = arith.constant 3 : i32
    %c0_i32_118 = arith.constant 0 : i32
    %125 = tpu.memref_slice %arg6[%c3_i32_117, %c0_i32_118] : memref<16x128xf32, #tpu.memory_space<vmem>> -> memref<1x128xf32, #tpu.memory_space<vmem>>
    %126 = tpu.memref_slice %arg7[%c3_i32_115] : memref<16x!tpu.dma_semaphore, #tpu.memory_space<semaphore_mem>> -> memref<1x!tpu.dma_semaphore, #tpu.memory_space<semaphore_mem>>
    %127 = tpu.memref_squeeze %126 : memref<1x!tpu.dma_semaphore, #tpu.memory_space<semaphore_mem>> -> memref<!tpu.dma_semaphore, #tpu.memory_space<semaphore_mem>>
    tpu.wait_dma2 semaphore(%127 : memref<!tpu.dma_semaphore, #tpu.memory_space<semaphore_mem>>) src(%124 : memref<1x128xf32, #tpu.memory_space<any>>) dst(%125 : memref<1x128xf32, #tpu.memory_space<vmem>>)
    %c4_i32_119 = arith.constant 4 : i32
    %c0_i32_120 = arith.constant 0 : i32
    %128 = tpu.memref_slice %arg2[%30, %c0_i32_120] : memref<1000x128xf32, #tpu.memory_space<any>> -> memref<1x128xf32, #tpu.memory_space<any>>
    %c4_i32_121 = arith.constant 4 : i32
    %c0_i32_122 = arith.constant 0 : i32
    %129 = tpu.memref_slice %arg6[%c4_i32_121, %c0_i32_122] : memref<16x128xf32, #tpu.memory_space<vmem>> -> memref<1x128xf32, #tpu.memory_space<vmem>>
    %130 = tpu.memref_slice %arg7[%c4_i32_119] : memref<16x!tpu.dma_semaphore, #tpu.memory_space<semaphore_mem>> -> memref<1x!tpu.dma_semaphore, #tpu.memory_space<semaphore_mem>>
    %131 = tpu.memref_squeeze %130 : memref<1x!tpu.dma_semaphore, #tpu.memory_space<semaphore_mem>> -> memref<!tpu.dma_semaphore, #tpu.memory_space<semaphore_mem>>
    tpu.wait_dma2 semaphore(%131 : memref<!tpu.dma_semaphore, #tpu.memory_space<semaphore_mem>>) src(%128 : memref<1x128xf32, #tpu.memory_space<any>>) dst(%129 : memref<1x128xf32, #tpu.memory_space<vmem>>)
    %c5_i32_123 = arith.constant 5 : i32
    %c0_i32_124 = arith.constant 0 : i32
    %132 = tpu.memref_slice %arg2[%37, %c0_i32_124] : memref<1000x128xf32, #tpu.memory_space<any>> -> memref<1x128xf32, #tpu.memory_space<any>>
    %c5_i32_125 = arith.constant 5 : i32
    %c0_i32_126 = arith.constant 0 : i32
    %133 = tpu.memref_slice %arg6[%c5_i32_125, %c0_i32_126] : memref<16x128xf32, #tpu.memory_space<vmem>> -> memref<1x128xf32, #tpu.memory_space<vmem>>
    %134 = tpu.memref_slice %arg7[%c5_i32_123] : memref<16x!tpu.dma_semaphore, #tpu.memory_space<semaphore_mem>> -> memref<1x!tpu.dma_semaphore, #tpu.memory_space<semaphore_mem>>
    %135 = tpu.memref_squeeze %134 : memref<1x!tpu.dma_semaphore, #tpu.memory_space<semaphore_mem>> -> memref<!tpu.dma_semaphore, #tpu.memory_space<semaphore_mem>>
    tpu.wait_dma2 semaphore(%135 : memref<!tpu.dma_semaphore, #tpu.memory_space<semaphore_mem>>) src(%132 : memref<1x128xf32, #tpu.memory_space<any>>) dst(%133 : memref<1x128xf32, #tpu.memory_space<vmem>>)
    %c6_i32_127 = arith.constant 6 : i32
    %c0_i32_128 = arith.constant 0 : i32
    %136 = tpu.memref_slice %arg2[%44, %c0_i32_128] : memref<1000x128xf32, #tpu.memory_space<any>> -> memref<1x128xf32, #tpu.memory_space<any>>
    %c6_i32_129 = arith.constant 6 : i32
    %c0_i32_130 = arith.constant 0 : i32
    %137 = tpu.memref_slice %arg6[%c6_i32_129, %c0_i32_130] : memref<16x128xf32, #tpu.memory_space<vmem>> -> memref<1x128xf32, #tpu.memory_space<vmem>>
    %138 = tpu.memref_slice %arg7[%c6_i32_127] : memref<16x!tpu.dma_semaphore, #tpu.memory_space<semaphore_mem>> -> memref<1x!tpu.dma_semaphore, #tpu.memory_space<semaphore_mem>>
    %139 = tpu.memref_squeeze %138 : memref<1x!tpu.dma_semaphore, #tpu.memory_space<semaphore_mem>> -> memref<!tpu.dma_semaphore, #tpu.memory_space<semaphore_mem>>
    tpu.wait_dma2 semaphore(%139 : memref<!tpu.dma_semaphore, #tpu.memory_space<semaphore_mem>>) src(%136 : memref<1x128xf32, #tpu.memory_space<any>>) dst(%137 : memref<1x128xf32, #tpu.memory_space<vmem>>)
    %c7_i32_131 = arith.constant 7 : i32
    %c0_i32_132 = arith.constant 0 : i32
    %140 = tpu.memref_slice %arg2[%51, %c0_i32_132] : memref<1000x128xf32, #tpu.memory_space<any>> -> memref<1x128xf32, #tpu.memory_space<any>>
    %c7_i32_133 = arith.constant 7 : i32
    %c0_i32_134 = arith.constant 0 : i32
    %141 = tpu.memref_slice %arg6[%c7_i32_133, %c0_i32_134] : memref<16x128xf32, #tpu.memory_space<vmem>> -> memref<1x128xf32, #tpu.memory_space<vmem>>
    %142 = tpu.memref_slice %arg7[%c7_i32_131] : memref<16x!tpu.dma_semaphore, #tpu.memory_space<semaphore_mem>> -> memref<1x!tpu.dma_semaphore, #tpu.memory_space<semaphore_mem>>
    %143 = tpu.memref_squeeze %142 : memref<1x!tpu.dma_semaphore, #tpu.memory_space<semaphore_mem>> -> memref<!tpu.dma_semaphore, #tpu.memory_space<semaphore_mem>>
    tpu.wait_dma2 semaphore(%143 : memref<!tpu.dma_semaphore, #tpu.memory_space<semaphore_mem>>) src(%140 : memref<1x128xf32, #tpu.memory_space<any>>) dst(%141 : memref<1x128xf32, #tpu.memory_space<vmem>>)
    %c8_i32_135 = arith.constant 8 : i32
    %c0_i32_136 = arith.constant 0 : i32
    %144 = tpu.memref_slice %arg2[%58, %c0_i32_136] : memref<1000x128xf32, #tpu.memory_space<any>> -> memref<1x128xf32, #tpu.memory_space<any>>
    %c8_i32_137 = arith.constant 8 : i32
    %c0_i32_138 = arith.constant 0 : i32
    %145 = tpu.memref_slice %arg6[%c8_i32_137, %c0_i32_138] : memref<16x128xf32, #tpu.memory_space<vmem>> -> memref<1x128xf32, #tpu.memory_space<vmem>>
    %146 = tpu.memref_slice %arg7[%c8_i32_135] : memref<16x!tpu.dma_semaphore, #tpu.memory_space<semaphore_mem>> -> memref<1x!tpu.dma_semaphore, #tpu.memory_space<semaphore_mem>>
    %147 = tpu.memref_squeeze %146 : memref<1x!tpu.dma_semaphore, #tpu.memory_space<semaphore_mem>> -> memref<!tpu.dma_semaphore, #tpu.memory_space<semaphore_mem>>
    tpu.wait_dma2 semaphore(%147 : memref<!tpu.dma_semaphore, #tpu.memory_space<semaphore_mem>>) src(%144 : memref<1x128xf32, #tpu.memory_space<any>>) dst(%145 : memref<1x128xf32, #tpu.memory_space<vmem>>)
    %c9_i32_139 = arith.constant 9 : i32
    %c0_i32_140 = arith.constant 0 : i32
    %148 = tpu.memref_slice %arg2[%65, %c0_i32_140] : memref<1000x128xf32, #tpu.memory_space<any>> -> memref<1x128xf32, #tpu.memory_space<any>>
    %c9_i32_141 = arith.constant 9 : i32
    %c0_i32_142 = arith.constant 0 : i32
    %149 = tpu.memref_slice %arg6[%c9_i32_141, %c0_i32_142] : memref<16x128xf32, #tpu.memory_space<vmem>> -> memref<1x128xf32, #tpu.memory_space<vmem>>
    %150 = tpu.memref_slice %arg7[%c9_i32_139] : memref<16x!tpu.dma_semaphore, #tpu.memory_space<semaphore_mem>> -> memref<1x!tpu.dma_semaphore, #tpu.memory_space<semaphore_mem>>
    %151 = tpu.memref_squeeze %150 : memref<1x!tpu.dma_semaphore, #tpu.memory_space<semaphore_mem>> -> memref<!tpu.dma_semaphore, #tpu.memory_space<semaphore_mem>>
    tpu.wait_dma2 semaphore(%151 : memref<!tpu.dma_semaphore, #tpu.memory_space<semaphore_mem>>) src(%148 : memref<1x128xf32, #tpu.memory_space<any>>) dst(%149 : memref<1x128xf32, #tpu.memory_space<vmem>>)
    %c10_i32_143 = arith.constant 10 : i32
    %c0_i32_144 = arith.constant 0 : i32
    %152 = tpu.memref_slice %arg2[%72, %c0_i32_144] : memref<1000x128xf32, #tpu.memory_space<any>> -> memref<1x128xf32, #tpu.memory_space<any>>
    %c10_i32_145 = arith.constant 10 : i32
    %c0_i32_146 = arith.constant 0 : i32
    %153 = tpu.memref_slice %arg6[%c10_i32_145, %c0_i32_146] : memref<16x128xf32, #tpu.memory_space<vmem>> -> memref<1x128xf32, #tpu.memory_space<vmem>>
    %154 = tpu.memref_slice %arg7[%c10_i32_143] : memref<16x!tpu.dma_semaphore, #tpu.memory_space<semaphore_mem>> -> memref<1x!tpu.dma_semaphore, #tpu.memory_space<semaphore_mem>>
    %155 = tpu.memref_squeeze %154 : memref<1x!tpu.dma_semaphore, #tpu.memory_space<semaphore_mem>> -> memref<!tpu.dma_semaphore, #tpu.memory_space<semaphore_mem>>
    tpu.wait_dma2 semaphore(%155 : memref<!tpu.dma_semaphore, #tpu.memory_space<semaphore_mem>>) src(%152 : memref<1x128xf32, #tpu.memory_space<any>>) dst(%153 : memref<1x128xf32, #tpu.memory_space<vmem>>)
    %c11_i32_147 = arith.constant 11 : i32
    %c0_i32_148 = arith.constant 0 : i32
    %156 = tpu.memref_slice %arg2[%79, %c0_i32_148] : memref<1000x128xf32, #tpu.memory_space<any>> -> memref<1x128xf32, #tpu.memory_space<any>>
    %c11_i32_149 = arith.constant 11 : i32
    %c0_i32_150 = arith.constant 0 : i32
    %157 = tpu.memref_slice %arg6[%c11_i32_149, %c0_i32_150] : memref<16x128xf32, #tpu.memory_space<vmem>> -> memref<1x128xf32, #tpu.memory_space<vmem>>
    %158 = tpu.memref_slice %arg7[%c11_i32_147] : memref<16x!tpu.dma_semaphore, #tpu.memory_space<semaphore_mem>> -> memref<1x!tpu.dma_semaphore, #tpu.memory_space<semaphore_mem>>
    %159 = tpu.memref_squeeze %158 : memref<1x!tpu.dma_semaphore, #tpu.memory_space<semaphore_mem>> -> memref<!tpu.dma_semaphore, #tpu.memory_space<semaphore_mem>>
    tpu.wait_dma2 semaphore(%159 : memref<!tpu.dma_semaphore, #tpu.memory_space<semaphore_mem>>) src(%156 : memref<1x128xf32, #tpu.memory_space<any>>) dst(%157 : memref<1x128xf32, #tpu.memory_space<vmem>>)
    %c12_i32_151 = arith.constant 12 : i32
    %c0_i32_152 = arith.constant 0 : i32
    %160 = tpu.memref_slice %arg2[%86, %c0_i32_152] : memref<1000x128xf32, #tpu.memory_space<any>> -> memref<1x128xf32, #tpu.memory_space<any>>
    %c12_i32_153 = arith.constant 12 : i32
    %c0_i32_154 = arith.constant 0 : i32
    %161 = tpu.memref_slice %arg6[%c12_i32_153, %c0_i32_154] : memref<16x128xf32, #tpu.memory_space<vmem>> -> memref<1x128xf32, #tpu.memory_space<vmem>>
    %162 = tpu.memref_slice %arg7[%c12_i32_151] : memref<16x!tpu.dma_semaphore, #tpu.memory_space<semaphore_mem>> -> memref<1x!tpu.dma_semaphore, #tpu.memory_space<semaphore_mem>>
    %163 = tpu.memref_squeeze %162 : memref<1x!tpu.dma_semaphore, #tpu.memory_space<semaphore_mem>> -> memref<!tpu.dma_semaphore, #tpu.memory_space<semaphore_mem>>
    tpu.wait_dma2 semaphore(%163 : memref<!tpu.dma_semaphore, #tpu.memory_space<semaphore_mem>>) src(%160 : memref<1x128xf32, #tpu.memory_space<any>>) dst(%161 : memref<1x128xf32, #tpu.memory_space<vmem>>)
    %c13_i32_155 = arith.constant 13 : i32
    %c0_i32_156 = arith.constant 0 : i32
    %164 = tpu.memref_slice %arg2[%93, %c0_i32_156] : memref<1000x128xf32, #tpu.memory_space<any>> -> memref<1x128xf32, #tpu.memory_space<any>>
    %c13_i32_157 = arith.constant 13 : i32
    %c0_i32_158 = arith.constant 0 : i32
    %165 = tpu.memref_slice %arg6[%c13_i32_157, %c0_i32_158] : memref<16x128xf32, #tpu.memory_space<vmem>> -> memref<1x128xf32, #tpu.memory_space<vmem>>
    %166 = tpu.memref_slice %arg7[%c13_i32_155] : memref<16x!tpu.dma_semaphore, #tpu.memory_space<semaphore_mem>> -> memref<1x!tpu.dma_semaphore, #tpu.memory_space<semaphore_mem>>
    %167 = tpu.memref_squeeze %166 : memref<1x!tpu.dma_semaphore, #tpu.memory_space<semaphore_mem>> -> memref<!tpu.dma_semaphore, #tpu.memory_space<semaphore_mem>>
    tpu.wait_dma2 semaphore(%167 : memref<!tpu.dma_semaphore, #tpu.memory_space<semaphore_mem>>) src(%164 : memref<1x128xf32, #tpu.memory_space<any>>) dst(%165 : memref<1x128xf32, #tpu.memory_space<vmem>>)
    %c14_i32_159 = arith.constant 14 : i32
    %c0_i32_160 = arith.constant 0 : i32
    %168 = tpu.memref_slice %arg2[%100, %c0_i32_160] : memref<1000x128xf32, #tpu.memory_space<any>> -> memref<1x128xf32, #tpu.memory_space<any>>
    %c14_i32_161 = arith.constant 14 : i32
    %c0_i32_162 = arith.constant 0 : i32
    %169 = tpu.memref_slice %arg6[%c14_i32_161, %c0_i32_162] : memref<16x128xf32, #tpu.memory_space<vmem>> -> memref<1x128xf32, #tpu.memory_space<vmem>>
    %170 = tpu.memref_slice %arg7[%c14_i32_159] : memref<16x!tpu.dma_semaphore, #tpu.memory_space<semaphore_mem>> -> memref<1x!tpu.dma_semaphore, #tpu.memory_space<semaphore_mem>>
    %171 = tpu.memref_squeeze %170 : memref<1x!tpu.dma_semaphore, #tpu.memory_space<semaphore_mem>> -> memref<!tpu.dma_semaphore, #tpu.memory_space<semaphore_mem>>
    tpu.wait_dma2 semaphore(%171 : memref<!tpu.dma_semaphore, #tpu.memory_space<semaphore_mem>>) src(%168 : memref<1x128xf32, #tpu.memory_space<any>>) dst(%169 : memref<1x128xf32, #tpu.memory_space<vmem>>)
    %c15_i32_163 = arith.constant 15 : i32
    %c0_i32_164 = arith.constant 0 : i32
    %172 = tpu.memref_slice %arg2[%107, %c0_i32_164] : memref<1000x128xf32, #tpu.memory_space<any>> -> memref<1x128xf32, #tpu.memory_space<any>>
    %c15_i32_165 = arith.constant 15 : i32
    %c0_i32_166 = arith.constant 0 : i32
    %173 = tpu.memref_slice %arg6[%c15_i32_165, %c0_i32_166] : memref<16x128xf32, #tpu.memory_space<vmem>> -> memref<1x128xf32, #tpu.memory_space<vmem>>
    %174 = tpu.memref_slice %arg7[%c15_i32_163] : memref<16x!tpu.dma_semaphore, #tpu.memory_space<semaphore_mem>> -> memref<1x!tpu.dma_semaphore, #tpu.memory_space<semaphore_mem>>
    %175 = tpu.memref_squeeze %174 : memref<1x!tpu.dma_semaphore, #tpu.memory_space<semaphore_mem>> -> memref<!tpu.dma_semaphore, #tpu.memory_space<semaphore_mem>>
    tpu.wait_dma2 semaphore(%175 : memref<!tpu.dma_semaphore, #tpu.memory_space<semaphore_mem>>) src(%172 : memref<1x128xf32, #tpu.memory_space<any>>) dst(%173 : memref<1x128xf32, #tpu.memory_space<vmem>>)
    %c0_167 = arith.constant 0 : index
    %c0_168 = arith.constant 0 : index
    %176 = vector.load %arg6[%c0_167, %c0_168] : memref<16x128xf32, #tpu.memory_space<vmem>>, vector<8x128xf32>
    %cst = arith.constant dense<0.000000e+00> : vector<128xf32>
    %177 = vector.multi_reduction <add>, %176, %cst [0] : vector<8x128xf32> to vector<128xf32>
    %178 = vector.shape_cast %177 : vector<128xf32> to vector<1x128xf32>
    %c8 = arith.constant 8 : index
    %c0_169 = arith.constant 0 : index
    %179 = vector.load %arg6[%c8, %c0_169] : memref<16x128xf32, #tpu.memory_space<vmem>>, vector<8x128xf32>
    %cst_170 = arith.constant dense<0.000000e+00> : vector<128xf32>
    %180 = vector.multi_reduction <add>, %179, %cst_170 [0] : vector<8x128xf32> to vector<128xf32>
    %181 = vector.shape_cast %180 : vector<128xf32> to vector<1x128xf32>
    %cst_171 = arith.constant 0.000000e+00 : f32
    %182 = vector.broadcast %cst_171 : f32 to vector<6x128xf32>
    %183 = tpu.concatenate %178, %181, %182 in 0 : vector<1x128xf32>, vector<1x128xf32>, vector<6x128xf32> -> vector<8x128xf32>
    %cst_172 = arith.constant 1.250000e-01 : f32
    %184 = vector.broadcast %cst_172 : f32 to vector<8x128xf32>
    %185 = arith.mulf %183, %184 : vector<8x128xf32>
    %c0_173 = arith.constant 0 : index
    %c0_174 = arith.constant 0 : index
    %186 = vector.load %arg3[%c0_173, %c0_174] : memref<128x128xf32, #tpu.memory_space<vmem>>, vector<128x128xf32>
    %cst_175 = arith.constant dense<0.000000e+00> : vector<8x128xf32>
    %187 = tpu.matmul %185, %186, %cst_175 {dimension_numbers = #tpu.dot_dimension_numbers<[1], [0], [0], [1], [0, 0, 1, 1], [], []>} : vector<8x128xf32>, vector<128x128xf32>, vector<8x128xf32> -> vector<8x128xf32>
    %c0_176 = arith.constant 0 : index
    %c0_177 = arith.constant 0 : index
    %188 = vector.load %arg4[%c0_176, %c0_177] : memref<1x128xf32, #tpu.memory_space<vmem>>, vector<1x128xf32>
    %189 = vector.broadcast %188 : vector<1x128xf32> to vector<8x128xf32>
    %190 = arith.addf %187, %189 : vector<8x128xf32>
    %c0_178 = arith.constant 0 : index
    %c0_179 = arith.constant 0 : index
    %191 = vector.load %arg5[%c0_178, %c0_179] : memref<8x128xf32, #tpu.memory_space<vmem>>, vector<8x128xf32>
    tpu.vector_store %arg5[%c0_178, %c0_179], %190 {strides = array<i32>} : memref<8x128xf32, #tpu.memory_space<vmem>>, vector<8x128xf32>,
    return
  }
  func.func @transform_1(%arg0: i32, %arg1: memref<2x8xi32, #tpu.memory_space<smem>>) -> (i32, i32) {
    %c0_i32 = arith.constant 0 : i32
    %c0_i32_0 = arith.constant 0 : i32
    %c0_i32_1 = arith.constant 0 : i32
    return %c0_i32, %c0_i32_0 : i32, i32
  }
  func.func @transform_2(%arg0: i32, %arg1: memref<2x8xi32, #tpu.memory_space<smem>>) -> (i32, i32) {
    %c0_i32 = arith.constant 0 : i32
    %c0_i32_0 = arith.constant 0 : i32
    %c0_i32_1 = arith.constant 0 : i32
    return %c0_i32, %c0_i32_0 : i32, i32
  }
  func.func @transform_3(%arg0: i32, %arg1: memref<2x8xi32, #tpu.memory_space<smem>>) -> (i32, i32) {
    %c0_i32 = arith.constant 0 : i32
    %c0_i32_0 = arith.constant 0 : i32
    %c0_i32_1 = arith.constant 0 : i32
    return %c0_i32, %c0_i32_0 : i32, i32
  }
}

</mosaic_0001>

<bundles_post_ra>
// kernel: simple_model_forward.1
= control target key start
LH: loop header
LB: loop body
LE: loop exit
PB: predicated region body
PF: predicated region fallthrough
CT: control target
= control target key end

     0   :  { %s1776_s0 = inlined_call_operand.hbm [shape: s32[2,8], index: 0, kind: input, shape index: {}]   ;;  %s1777_s1 = inlined_call_operand.hbm [shape: f32[1000,128], index: 1, kind: input, shape index: {}]   ;;  %s1778_s2 = inlined_call_operand.hbm [shape: f32[128,128], index: 2, kind: input, shape index: {}]   ;;  %s1779_s3 = inlined_call_operand.vmem [shape: f32[1,128], index: 3, kind: input, shape index: {}]   ;;  %s1780_s4 = inlined_call_operand.vmem [shape: f32[8,128], index: 4, kind: output, shape index: {}]  }
   0x1   :  { %s902_s17 = scalar_lea.hbm %s1776_s0, 32 }
   0x2   :  { %p903_p0 = scmp.ne.s32.totalorder %s1776_s0, %s902_s17  ;;  %p906_p1 = scmp.lt.u32.totalorder %s902_s17, %s1776_s0 }
   0x4   :  { %p908_p2 = pnand %p906_p1, %p903_p0 }
   0x6   :  { %911 = shalt.err (!%p908_p2)  }
   0x7   :  { %s1354_s22 = smov [#allocation5]  }
   0x8   :  { %10 = dma.hbm_to_smem %s1776_s0, 32, %s1354_s22, [#allocation4] }
   0x9   :  { %1318 = dma.done.wait [#allocation4], 32 }
   0xa   :  { %1319 = vsyncadd [#allocation4], 4294967264 }
   0xb   :  { %12 = sfence }
   0xc   :  { %13 = vsyncpa [#allocation7], 0  ;;  %s1355_s25 = smov [#allocation6]   ;;  %s912_s29 = scalar_lea.hbm %s1778_s2, 2048 }
   0xd   :  { %s19_s26 = sshll.u32 %s1355_s25, 4  ;;  %p913_p3 = scmp.ne.s32.totalorder %s1778_s2, %s912_s29  ;;  %s20_s26 = int_to_ptr.vmem [resolvable:$true] %s19_s26 }
   0xe   :  { %p916_p4 = scmp.lt.u32.totalorder %s912_s29, %s1778_s2 }
  0x10   :  { %p918_p5 = pnand %p916_p4, %p913_p3 }
  0x12   :  { %921 = shalt.err (!%p918_p5)
}
  0x13   :  { %s922_s0 = scalar_lea.vmem %s20_s26, 2048  ;;  %p927_p7 = scmp.lt.s32.totalorder %s20_s26, %s20_s26 }
  0x14   :  { %p923_p6 = scmp.ne.s32.totalorder %s20_s26, %s922_s0  ;;  %p928_p8 = scmp.lt.s32.totalorder %s922_s0, %s922_s0 }
  0x16   :  { %p929_p9 = por %p928_p8, %p927_p7 }
  0x18   :  { %p930_p10 = pnand %p929_p9, %p923_p6 }
  0x1a   :  { %933 = shalt.err (!%p930_p10)
}
  0x1b   :  { %s1356_s8 = smov 128   ;;  %s1357_s9 = smov 8  }
  0x1c   :  { %25 = dma.hbm_to_vmem [thread:$0]  %s1778_s2, 2048, %s20_s26, [#allocation7], %s1356_s8, %s1356_s8, %s1357_s9  }
  0x1d   :  { %1320 = dma.done.wait [#allocation7], 2048  }
  0x1e   :  { %1321 = vsyncadd [#allocation7], 4294965248  ;;  %s31_s12 = sld [smem:[#allocation5]]  ;;  %s1358_s13 = smov [#allocation2]  }
  0x1f   :  { %s45_s14 = sshll.u32 %s1358_s13, 4  ;;  %s649_s15 = sld [smem:[#allocation5 + $0x1]]  ;;  %s1426_s14 = int_to_ptr.vmem [resolvable:$true] %s45_s14 }
  0x20   :  { %s1359_s16 = smov [#allocation2 + $0x1]   ;;  %s1428_s18 = sld [smem:[#allocation5 + $0x2]] }
  0x21   :  { %s65_s17 = sshll.u32 %s1359_s16, 4  ;;  %s1360_s19 = smov [#allocation2 + $0x2]   ;;  %s1430_s17 = int_to_ptr.vmem [resolvable:$true] %s65_s17 }
  0x22   :  { %s85_s20 = sshll.u32 %s1360_s19, 4  ;;  %s1432_s21 = sld [smem:[#allocation5 + $0x3]]  ;;  %s1434_s20 = int_to_ptr.vmem [resolvable:$true] %s85_s20 }
  0x23   :  { %s1443_s29 = scalar_lea.hbm %s1777_s1, 16000 }
  0x24   :  { %p32_p11 = scmp.gt.s32.totalorder %s31_s12, 0  ;;  %p643_p12 = scmp.lt.s32.totalorder %s31_s12, 999 }
  0x25   :  { %p50_p13 = scmp.gt.s32.totalorder %s649_s15, 0  ;;  %p650_p0 = scmp.lt.s32.totalorder %s649_s15, 999 }
  0x26   :  { %s1786_s12 = smov (!%p32_p11, %s31_s12), 0  ;;  %p70_p1 = scmp.gt.s32.totalorder %s1428_s18, 0 }
  0x27   :  { %s1788_s15 = smov (!%p50_p13, %s649_s15), 0  ;;  %s1790_s12 = smov (!%p643_p12, %s1786_s12), 999 }
  0x28   :  { %s1792_s15 = smov (!%p650_p0, %s1788_s15), 999  ;;  %s648_s2 = sshll.u32 %s1790_s12, 4 }
  0x29   :  { %s37_s24 = scalar_lea.hbm %s1777_s1, %s648_s2  ;;  %s655_s25 = sshll.u32 %s1792_s15, 4 }
  0x2a   :  { %s934_s26 = scalar_lea.hbm %s37_s24, 16  ;;  %p937_p3 = scmp.lt.u32.totalorder %s37_s24, %s1777_s1 }
  0x2b   :  { %p935_p2 = scmp.ne.s32.totalorder %s37_s24, %s934_s26  ;;  %p938_p4 = scmp.lt.u32.totalorder %s1443_s29, %s934_s26 }
  0x2c   :  { %p940_p6 = scmp.lt.u32.totalorder %s934_s26, %s37_s24 }
  0x2d   :  { %p939_p5 = por %p938_p4, %p937_p3 }
  0x2f   :  { %p941_p7 = por %p940_p6, %p939_p5 }
  0x31   :  { %p942_p8 = pnand %p941_p7, %p935_p2 }
  0x33   :  { %945 = shalt.err (!%p942_p8)  }
  0x34   :  { %s946_s6 = scalar_lea.vmem %s1426_s14, 16  ;;  %s1452_s7 = scalar_lea.vmem %s1426_s14, 256 }
  0x35   :  { %p947_p9 = scmp.ne.s32.totalorder %s1426_s14, %s946_s6  ;;  %p951_p10 = scmp.lt.s32.totalorder %s1426_s14, %s1426_s14 }
  0x36   :  { %p952_p11 = scmp.lt.s32.totalorder %s1452_s7, %s946_s6 }
  0x38   :  { %p953_p12 = por %p952_p11, %p951_p10 }
  0x3a   :  { %p954_p13 = pnand %p953_p12, %p947_p9 }
  0x3c   :  { %957 = shalt.err (!%p954_p13)  }
  0x3d   :  { %48 = dma.hbm_to_vmem [thread:$0]  %s37_s24, 16, %s1426_s14, [#allocation3] }
  0x3e   :  { %s55_s9 = scalar_lea.hbm %s1777_s1, %s655_s25  ;;  %p657_p0 = scmp.lt.s32.totalorder %s1428_s18, 999 }
  0x3f   :  { %s958_s10 = scalar_lea.hbm %s55_s9, 16  ;;  %p961_p3 = scmp.lt.u32.totalorder %s55_s9, %s1777_s1 }
  0x40   :  { %p959_p2 = scmp.ne.s32.totalorder %s55_s9, %s958_s10  ;;  %p962_p4 = scmp.lt.u32.totalorder %s1443_s29, %s958_s10 }
  0x41   :  { %p964_p6 = scmp.lt.u32.totalorder %s958_s10, %s55_s9 }
  0x42   :  { %p963_p5 = por %p962_p4, %p961_p3 }
  0x44   :  { %p965_p7 = por %p964_p6, %p963_p5 }
  0x46   :  { %p966_p8 = pnand %p965_p7, %p959_p2 }
  0x48   :  { %969 = shalt.err (!%p966_p8)  }
  0x49   :  { %s970_s13 = scalar_lea.vmem %s1430_s17, 16  ;;  %p975_p10 = scmp.lt.s32.totalorder %s1430_s17, %s1426_s14 }
  0x4a   :  { %p971_p9 = scmp.ne.s32.totalorder %s1430_s17, %s970_s13  ;;  %p976_p11 = scmp.lt.s32.totalorder %s1452_s7, %s970_s13 }
  0x4c   :  { %p977_p12 = por %p976_p11, %p975_p10 }
  0x4e   :  { %p978_p13 = pnand %p977_p12, %p971_p9 }
  0x50   :  { %981 = shalt.err (!%p978_p13)  }
  0x51   :  { %68 = dma.hbm_to_vmem [thread:$0]  %s55_s9, 16, %s1430_s17, [#allocation3 + $0x1] }
  0x52   :  { %s71_s15 = scalar_select %p70_p1, %s1428_s18, 0 }
  0x53   :  { %p90_p2 = scmp.gt.s32.totalorder %s1432_s21, 0  ;;  %p664_p3 = scmp.lt.s32.totalorder %s1432_s21, 999 }
  0x54   :  { %s1794_s15 = smov (!%p657_p0, %s71_s15), 999  ;;  %s1361_s2 = smov [#allocation2 + $0x3]  }
  0x55   :  { %s91_s16 = scalar_select %p90_p2, %s1432_s21, 0 }
  0x56   :  { %s662_s19 = sshll.u32 %s1794_s15, 4  ;;  %s105_s22 = sshll.u32 %s1361_s2, 4  ;;  %s1483_s22 = int_to_ptr.vmem [resolvable:$true] %s105_s22 }
  0x57   :  { %s75_s25 = scalar_lea.hbm %s1777_s1, %s662_s19 }
  0x58   :  { %s982_s26 = scalar_lea.hbm %s75_s25, 16  ;;  %p985_p1 = scmp.lt.u32.totalorder %s75_s25, %s1777_s1 }
  0x59   :  { %p983_p4 = scmp.ne.s32.totalorder %s75_s25, %s982_s26  ;;  %p986_p5 = scmp.lt.u32.totalorder %s1443_s29, %s982_s26 }
  0x5a   :  { %p988_p7 = scmp.lt.u32.totalorder %s982_s26, %s75_s25 }
  0x5b   :  { %p987_p6 = por %p986_p5, %p985_p1 }
  0x5d   :  { %p989_p0 = por %p988_p7, %p987_p6 }
  0x5f   :  { %p990_p8 = pnand %p989_p0, %p983_p4 }
  0x61   :  { %993 = shalt.err (!%p990_p8)  }
  0x62   :  { %s994_s18 = scalar_lea.vmem %s1434_s20, 16  ;;  %p999_p10 = scmp.lt.s32.totalorder %s1434_s20, %s1426_s14 }
  0x63   :  { %p995_p9 = scmp.ne.s32.totalorder %s1434_s20, %s994_s18  ;;  %p1000_p11 = scmp.lt.s32.totalorder %s1452_s7, %s994_s18 }
  0x65   :  { %p1001_p12 = por %p1000_p11, %p999_p10 }
  0x67   :  { %p1002_p13 = pnand %p1001_p12, %p995_p9 }
  0x69   :  { %1005 = shalt.err (!%p1002_p13)  }
  0x6a   :  { %88 = dma.hbm_to_vmem [thread:$0]  %s75_s25, 16, %s1434_s20, [#allocation3 + $0x2] }
  0x6b   :  { %s1796_s16 = smov (!%p664_p3, %s91_s16), 999  ;;  %s1497_s28 = sld [smem:[#allocation5 + $0x4]] }
  0x6c   :  { %s669_s30 = sshll.u32 %s1796_s16, 4  ;;  %s1362_s5 = smov [#allocation2 + $0x4]  }
  0x6d   :  { %s125_s6 = sshll.u32 %s1362_s5, 4  ;;  %s95_s9 = scalar_lea.hbm %s1777_s1, %s669_s30  ;;  %s1502_s6 = int_to_ptr.vmem [resolvable:$true] %s125_s6 }
  0x6e   :  { %s1006_s10 = scalar_lea.hbm %s95_s9, 16  ;;  %p1009_p4 = scmp.lt.u32.totalorder %s95_s9, %s1777_s1 }
  0x6f   :  { %p1007_p2 = scmp.ne.s32.totalorder %s95_s9, %s1006_s10  ;;  %p1010_p1 = scmp.lt.u32.totalorder %s1443_s29, %s1006_s10 }
  0x70   :  { %p1012_p3 = scmp.lt.u32.totalorder %s1006_s10, %s95_s9 }
  0x71   :  { %p1011_p5 = por %p1010_p1, %p1009_p4 }
  0x73   :  { %p1013_p6 = por %p1012_p3, %p1011_p5 }
  0x75   :  { %p1014_p7 = pnand %p1013_p6, %p1007_p2 }
  0x77   :  { %1017 = shalt.err (!%p1014_p7)  }
  0x78   :  { %s1018_s20 = scalar_lea.vmem %s1483_s22, 16  ;;  %p1023_p8 = scmp.lt.s32.totalorder %s1483_s22, %s1426_s14 }
  0x79   :  { %p1019_p0 = scmp.ne.s32.totalorder %s1483_s22, %s1018_s20  ;;  %p1024_p9 = scmp.lt.s32.totalorder %s1452_s7, %s1018_s20 }
  0x7b   :  { %p1025_p10 = por %p1024_p9, %p1023_p8 }
  0x7d   :  { %p1026_p11 = pnand %p1025_p10, %p1019_p0 }
  0x7f   :  { %1029 = shalt.err (!%p1026_p11)  }
  0x80   :  { %108 = dma.hbm_to_vmem [thread:$0]  %s95_s9, 16, %s1483_s22, [#allocation3 + $0x3] }
  0x81   :  { %s1514_s21 = sld [smem:[#allocation5 + $0x5]]  ;;  %s1363_s13 = smov [#allocation2 + $0x5]  }
  0x82   :  { %s145_s15 = sshll.u32 %s1363_s13, 4  ;;  %s1516_s16 = sld [smem:[#allocation5 + $0x6]]  ;;  %s1520_s15 = int_to_ptr.vmem [resolvable:$true] %s145_s15 }
  0x83   :  { %p110_p12 = scmp.gt.s32.totalorder %s1497_s28, 0  ;;  %p671_p13 = scmp.lt.s32.totalorder %s1497_s28, 999 }
  0x84   :  { %s1364_s19 = smov [#allocation2 + $0x6]   ;;  %s1525_s22 = sld [smem:[#allocation5 + $0x7]] }
  0x85   :  { %s1798_s28 = smov (!%p110_p12, %s1497_s28), 0  ;;  %s1523_s2 = sshll.u32 %s1364_s19, 4  ;;  %s1555_s2 = int_to_ptr.vmem [resolvable:$true] %s1523_s2 }
  0x86   :  { %s1800_s28 = smov (!%p671_p13, %s1798_s28), 999 }
  0x87   :  { %p130_p2 = scmp.gt.s32.totalorder %s1514_s21, 0  ;;  %s676_s23 = sshll.u32 %s1800_s28, 4 }
  0x88   :  { %p150_p1 = scmp.gt.s32.totalorder %s1516_s16, 0  ;;  %s115_s26 = scalar_lea.hbm %s1777_s1, %s676_s23 }
  0x89   :  { %s1030_s27 = scalar_lea.hbm %s115_s26, 16  ;;  %p1033_p6 = scmp.lt.u32.totalorder %s115_s26, %s1777_s1 }
  0x8a   :  { %p1031_p3 = scmp.ne.s32.totalorder %s115_s26, %s1030_s27  ;;  %p1034_p7 = scmp.lt.u32.totalorder %s1443_s29, %s1030_s27 }
  0x8b   :  { %p1036_p8 = scmp.lt.u32.totalorder %s1030_s27, %s115_s26 }
  0x8c   :  { %p1035_p0 = por %p1034_p7, %p1033_p6 }
  0x8e   :  { %p1037_p9 = por %p1036_p8, %p1035_p0 }
  0x90   :  { %p1038_p10 = pnand %p1037_p9, %p1031_p3 }
  0x92   :  { %1041 = shalt.err (!%p1038_p10)  }
  0x93   :  { %s1042_s28 = scalar_lea.vmem %s1502_s6, 16  ;;  %p1047_p12 = scmp.lt.s32.totalorder %s1502_s6, %s1426_s14 }
  0x94   :  { %p1043_p11 = scmp.ne.s32.totalorder %s1502_s6, %s1042_s28  ;;  %p1048_p13 = scmp.lt.s32.totalorder %s1452_s7, %s1042_s28 }
  0x96   :  { %p1049_p5 = por %p1048_p13, %p1047_p12 }
  0x98   :  { %p1050_p4 = pnand %p1049_p5, %p1043_p11 }
  0x9a   :  { %1053 = shalt.err (!%p1050_p4)  }
  0x9b   :  { %128 = dma.hbm_to_vmem [thread:$0]  %s115_s26, 16, %s1502_s6, [#allocation3 + $0x4] }
  0x9c   :  { %s131_s30 = scalar_select %p130_p2, %s1514_s21, 0 }
  0x9d   :  { %s151_s5 = scalar_select %p150_p1, %s1516_s16, 0 }
  0x9e   :  { %p1781_p3 = scmp.lt.s32.totalorder %s1514_s21, 999  ;;  %p1782_p6 = scmp.lt.s32.totalorder %s1516_s16, 999 }
  0xa0   :  { %s1802_s30 = smov (!%p1781_p3, %s131_s30), 999  ;;  %s1804_s5 = smov (!%p1782_p6, %s151_s5), 999 }
  0xa1   :  { %s683_s0 = sshll.u32 %s1802_s30, 4  ;;  %s690_s11 = sshll.u32 %s1804_s5, 4 }
  0xa2   :  { %s135_s10 = scalar_lea.hbm %s1777_s1, %s683_s0 }
  0xa3   :  { %s1054_s12 = scalar_lea.hbm %s135_s10, 16  ;;  %p1057_p2 = scmp.lt.u32.totalorder %s135_s10, %s1777_s1 }
  0xa4   :  { %p1055_p4 = scmp.ne.s32.totalorder %s135_s10, %s1054_s12  ;;  %p1058_p5 = scmp.lt.u32.totalorder %s1443_s29, %s1054_s12 }
  0xa5   :  { %p1060_p7 = scmp.lt.u32.totalorder %s1054_s12, %s135_s10 }
  0xa6   :  { %p1059_p1 = por %p1058_p5, %p1057_p2 }
  0xa8   :  { %p1061_p0 = por %p1060_p7, %p1059_p1 }
  0xaa   :  { %p1062_p8 = pnand %p1061_p0, %p1055_p4 }
  0xac   :  { %1065 = shalt.err (!%p1062_p8)  }
  0xad   :  { %s1066_s21 = scalar_lea.vmem %s1520_s15, 16  ;;  %p1071_p10 = scmp.lt.s32.totalorder %s1520_s15, %s1426_s14 }
  0xae   :  { %p1067_p9 = scmp.ne.s32.totalorder %s1520_s15, %s1066_s21  ;;  %p1072_p11 = scmp.lt.s32.totalorder %s1452_s7, %s1066_s21 }
  0xb0   :  { %p1073_p12 = por %p1072_p11, %p1071_p10 }
  0xb2   :  { %p1074_p13 = pnand %p1073_p12, %p1067_p9 }
  0xb4   :  { %1077 = shalt.err (!%p1074_p13)  }
  0xb5   :  { %148 = dma.hbm_to_vmem [thread:$0]  %s135_s10, 16, %s1520_s15, [#allocation3 + $0x5] }
  0xb6   :  { %s155_s19 = scalar_lea.hbm %s1777_s1, %s690_s11  ;;  %p170_p3 = scmp.gt.s32.totalorder %s1525_s22, 0 }
  0xb7   :  { %s1078_s23 = scalar_lea.hbm %s155_s19, 16  ;;  %p1081_p4 = scmp.lt.u32.totalorder %s155_s19, %s1777_s1 }
  0xb8   :  { %p1079_p6 = scmp.ne.s32.totalorder %s155_s19, %s1078_s23  ;;  %p1082_p2 = scmp.lt.u32.totalorder %s1443_s29, %s1078_s23 }
  0xb9   :  { %p1084_p1 = scmp.lt.u32.totalorder %s1078_s23, %s155_s19 }
  0xba   :  { %p1083_p5 = por %p1082_p2, %p1081_p4 }
  0xbc   :  { %p1085_p7 = por %p1084_p1, %p1083_p5 }
  0xbe   :  { %p1086_p0 = pnand %p1085_p7, %p1079_p6 }
  0xc0   :  { %1089 = shalt.err (!%p1086_p0)  }
  0xc1   :  { %s1090_s15 = scalar_lea.vmem %s1555_s2, 16  ;;  %p1095_p9 = scmp.lt.s32.totalorder %s1555_s2, %s1426_s14 }
  0xc2   :  { %p1091_p8 = scmp.ne.s32.totalorder %s1555_s2, %s1090_s15  ;;  %p1096_p10 = scmp.lt.s32.totalorder %s1452_s7, %s1090_s15 }
  0xc4   :  { %p1097_p11 = por %p1096_p10, %p1095_p9 }
  0xc6   :  { %p1098_p12 = pnand %p1097_p11, %p1091_p8 }
  0xc8   :  { %1101 = shalt.err (!%p1098_p12)  }
  0xc9   :  { %168 = dma.hbm_to_vmem [thread:$0]  %s155_s19, 16, %s1555_s2, [#allocation3 + $0x6] }
  0xca   :  { %s171_s26 = scalar_select %p170_p3, %s1525_s22, 0 }
  0xcb   :  { %p692_p13 = scmp.lt.s32.totalorder %s1525_s22, 999  ;;  %s1365_s27 = smov [#allocation2 + $0x7]  }
  0xcc   :  { %s185_s17 = sshll.u32 %s1365_s27, 4  ;;  %s1588_s18 = sld [smem:[#allocation5 + $0x80]]  ;;  %s186_s17 = int_to_ptr.vmem [resolvable:$true] %s185_s17 }
  0xcd   :  { %s1806_s26 = smov (!%p692_p13, %s171_s26), 999  ;;  %s1366_s30 = smov [#allocation2 + $0x8]  }
  0xce   :  { %s697_s28 = sshll.u32 %s1806_s26, 4  ;;  %s205_s5 = sshll.u32 %s1366_s30, 4  ;;  %s1593_s5 = int_to_ptr.vmem [resolvable:$true] %s205_s5 }
  0xcf   :  { %s175_s9 = scalar_lea.hbm %s1777_s1, %s697_s28 }
  0xd0   :  { %s1102_s2 = scalar_lea.hbm %s175_s9, 16  ;;  %p1105_p3 = scmp.lt.u32.totalorder %s175_s9, %s1777_s1 }
  0xd1   :  { %p1103_p6 = scmp.ne.s32.totalorder %s175_s9, %s1102_s2  ;;  %p1106_p4 = scmp.lt.u32.totalorder %s1443_s29, %s1102_s2 }
  0xd2   :  { %p1108_p5 = scmp.lt.u32.totalorder %s1102_s2, %s175_s9 }
  0xd3   :  { %p1107_p2 = por %p1106_p4, %p1105_p3 }
  0xd5   :  { %p1109_p1 = por %p1108_p5, %p1107_p2 }
  0xd7   :  { %p1110_p7 = pnand %p1109_p1, %p1103_p6 }
  0xd9   :  { %1113 = shalt.err (!%p1110_p7)  }
  0xda   :  { %s1114_s22 = scalar_lea.vmem %s186_s17, 16  ;;  %p1119_p8 = scmp.lt.s32.totalorder %s186_s17, %s1426_s14 }
  0xdb   :  { %p1115_p0 = scmp.ne.s32.totalorder %s186_s17, %s1114_s22  ;;  %p1120_p9 = scmp.lt.s32.totalorder %s1452_s7, %s1114_s22 }
  0xdd   :  { %p1121_p10 = por %p1120_p9, %p1119_p8 }
  0xdf   :  { %p1122_p11 = pnand %p1121_p10, %p1115_p0 }
  0xe1   :  { %1125 = shalt.err (!%p1122_p11)  }
  0xe2   :  { %188 = dma.hbm_to_vmem [thread:$0]  %s175_s9, 16, %s186_s17, [#allocation3 + $0x7] }
  0xe3   :  { %p190_p12 = scmp.gt.s32.totalorder %s1588_s18, 0  ;;  %p699_p13 = scmp.lt.s32.totalorder %s1588_s18, 999 }
  0xe4   :  { %s1603_s12 = sld [smem:[#allocation5 + $0x81]]  ;;  %s1367_s20 = smov [#allocation2 + $0x9]  }
  0xe5   :  { %s1808_s18 = smov (!%p190_p12, %s1588_s18), 0  ;;  %s225_s6 = sshll.u32 %s1367_s20, 4  ;;  %s1608_s6 = int_to_ptr.vmem [resolvable:$true] %s225_s6 }
  0xe6   :  { %s1606_s21 = sld [smem:[#allocation5 + $0x82]]  ;;  %s1810_s18 = smov (!%p699_p13, %s1808_s18), 999 }
  0xe7   :  { %s704_s13 = sshll.u32 %s1810_s18, 4  ;;  %s1368_s16 = smov [#allocation2 + $0xa]  }
  0xe8   :  { %s245_s19 = sshll.u32 %s1368_s16, 4  ;;  %s195_s25 = scalar_lea.hbm %s1777_s1, %s704_s13  ;;  %s1630_s19 = int_to_ptr.vmem [resolvable:$true] %s245_s19 }
  0xe9   :  { %s1126_s15 = scalar_lea.hbm %s195_s25, 16  ;;  %p1129_p4 = scmp.lt.u32.totalorder %s195_s25, %s1777_s1 }
  0xea   :  { %p210_p6 = scmp.gt.s32.totalorder %s1603_s12, 0  ;;  %p1127_p3 = scmp.ne.s32.totalorder %s195_s25, %s1126_s15 }
  0xeb   :  { %p1130_p2 = scmp.lt.u32.totalorder %s1443_s29, %s1126_s15  ;;  %p1132_p1 = scmp.lt.u32.totalorder %s1126_s15, %s195_s25 }
  0xed   :  { %p1131_p5 = por %p1130_p2, %p1129_p4 }
  0xef   :  { %p1133_p7 = por %p1132_p1, %p1131_p5 }
  0xf1   :  { %p1134_p0 = pnand %p1133_p7, %p1127_p3 }
  0xf3   :  { %1137 = shalt.err (!%p1134_p0)  }
  0xf4   :  { %s1138_s17 = scalar_lea.vmem %s1593_s5, 16  ;;  %p1143_p9 = scmp.lt.s32.totalorder %s1593_s5, %s1426_s14 }
  0xf5   :  { %p1139_p8 = scmp.ne.s32.totalorder %s1593_s5, %s1138_s17  ;;  %p1144_p10 = scmp.lt.s32.totalorder %s1452_s7, %s1138_s17 }
  0xf7   :  { %p1145_p11 = por %p1144_p10, %p1143_p9 }
  0xf9   :  { %p1146_p12 = pnand %p1145_p11, %p1139_p8 }
  0xfb   :  { %1149 = shalt.err (!%p1146_p12)  }
  0xfc   :  { %208 = dma.hbm_to_vmem [thread:$0]  %s195_s25, 16, %s1593_s5, [#allocation3 + $0x8] }
  0xfd   :  { %s211_s18 = scalar_select %p210_p6, %s1603_s12, 0 }
  0xfe   :  { %p706_p13 = scmp.lt.s32.totalorder %s1603_s12, 999  ;;  %p230_p3 = scmp.gt.s32.totalorder %s1606_s21, 0 }
  0xff   :  { %p713_p4 = scmp.lt.s32.totalorder %s1606_s21, 999  ;;  %s1633_s0 = sld [smem:[#allocation5 + $0x83]] }
 0x100   :  { %s1812_s18 = smov (!%p706_p13, %s211_s18), 999 }
 0x101   :  { %s231_s28 = scalar_select %p230_p3, %s1606_s21, 0 }
 0x102   :  { %s711_s30 = sshll.u32 %s1812_s18, 4 }
 0x103   :  { %s215_s2 = scalar_lea.hbm %s1777_s1, %s711_s30 }
 0x104   :  { %s1150_s10 = scalar_lea.hbm %s215_s2, 16  ;;  %p1153_p6 = scmp.lt.u32.totalorder %s215_s2, %s1777_s1 }
 0x105   :  { %p1151_p2 = scmp.ne.s32.totalorder %s215_s2, %s1150_s10  ;;  %p1154_p5 = scmp.lt.u32.totalorder %s1443_s29, %s1150_s10 }
 0x106   :  { %p1156_p7 = scmp.lt.u32.totalorder %s1150_s10, %s215_s2 }
 0x107   :  { %p1155_p1 = por %p1154_p5, %p1153_p6 }
 0x109   :  { %p1157_p0 = por %p1156_p7, %p1155_p1 }
 0x10b   :  { %p1158_p8 = pnand %p1157_p0, %p1151_p2 }
 0x10d   :  { %1161 = shalt.err (!%p1158_p8)  }
 0x10e   :  { %s1162_s22 = scalar_lea.vmem %s1608_s6, 16  ;;  %p1167_p10 = scmp.lt.s32.totalorder %s1608_s6, %s1426_s14 }
 0x10f   :  { %p1163_p9 = scmp.ne.s32.totalorder %s1608_s6, %s1162_s22  ;;  %p1168_p11 = scmp.lt.s32.totalorder %s1452_s7, %s1162_s22 }
 0x111   :  { %p1169_p12 = por %p1168_p11, %p1167_p10 }
 0x113   :  { %p1170_p13 = pnand %p1169_p12, %p1163_p9 }
 0x115   :  { %1173 = shalt.err (!%p1170_p13)  }
 0x116   :  { %228 = dma.hbm_to_vmem [thread:$0]  %s215_s2, 16, %s1608_s6, [#allocation3 + $0x9] }
 0x117   :  { %s1814_s28 = smov (!%p713_p4, %s231_s28), 999  ;;  %s1369_s12 = smov [#allocation2 + $0xb]  }
 0x118   :  { %s265_s20 = sshll.u32 %s1369_s12, 4  ;;  %s1650_s13 = sld [smem:[#allocation5 + $0x84]]  ;;  %s1652_s20 = int_to_ptr.vmem [resolvable:$true] %s265_s20 }
 0x119   :  { %s718_s16 = sshll.u32 %s1814_s28, 4  ;;  %p250_p3 = scmp.gt.s32.totalorder %s1633_s0, 0 }
 0x11a   :  { %s235_s25 = scalar_lea.hbm %s1777_s1, %s718_s16 }
 0x11b   :  { %s1174_s15 = scalar_lea.hbm %s235_s25, 16  ;;  %p1177_p6 = scmp.lt.u32.totalorder %s235_s25, %s1777_s1 }
 0x11c   :  { %p1175_p2 = scmp.ne.s32.totalorder %s235_s25, %s1174_s15  ;;  %p1178_p5 = scmp.lt.u32.totalorder %s1443_s29, %s1174_s15 }
 0x11d   :  { %p1180_p1 = scmp.lt.u32.totalorder %s1174_s15, %s235_s25 }
 0x11e   :  { %p1179_p4 = por %p1178_p5, %p1177_p6 }
 0x120   :  { %p1181_p7 = por %p1180_p1, %p1179_p4 }
 0x122   :  { %p1182_p0 = pnand %p1181_p7, %p1175_p2 }
 0x124   :  { %1185 = shalt.err (!%p1182_p0)  }
 0x125   :  { %s1186_s6 = scalar_lea.vmem %s1630_s19, 16  ;;  %p1191_p9 = scmp.lt.s32.totalorder %s1630_s19, %s1426_s14 }
 0x126   :  { %p1187_p8 = scmp.ne.s32.totalorder %s1630_s19, %s1186_s6  ;;  %p1192_p10 = scmp.lt.s32.totalorder %s1452_s7, %s1186_s6 }
 0x128   :  { %p1193_p11 = por %p1192_p10, %p1191_p9 }
 0x12a   :  { %p1194_p12 = pnand %p1193_p11, %p1187_p8 }
 0x12c   :  { %1197 = shalt.err (!%p1194_p12)  }
 0x12d   :  { %248 = dma.hbm_to_vmem [thread:$0]  %s235_s25, 16, %s1630_s19, [#allocation3 + $0xa] }
 0x12e   :  { %s251_s21 = scalar_select %p250_p3, %s1633_s0, 0 }
 0x12f   :  { %p720_p13 = scmp.lt.s32.totalorder %s1633_s0, 999  ;;  %p270_p2 = scmp.gt.s32.totalorder %s1650_s13, 0 }
 0x130   :  { %p727_p6 = scmp.lt.s32.totalorder %s1650_s13, 999  ;;  %s1370_s28 = smov [#allocation2 + $0xc]  }
 0x131   :  { %s1816_s21 = smov (!%p720_p13, %s251_s21), 999  ;;  %s285_s30 = sshll.u32 %s1370_s28, 4  ;;  %s1678_s30 = int_to_ptr.vmem [resolvable:$true] %s285_s30 }
 0x132   :  { %s271_s17 = scalar_select %p270_p2, %s1650_s13, 0 }
 0x133   :  { %s725_s18 = sshll.u32 %s1816_s21, 4 }
 0x134   :  { %s255_s2 = scalar_lea.hbm %s1777_s1, %s725_s18 }
 0x135   :  { %s1198_s10 = scalar_lea.hbm %s255_s2, 16  ;;  %p1201_p3 = scmp.lt.u32.totalorder %s255_s2, %s1777_s1 }
 0x136   :  { %p1199_p5 = scmp.ne.s32.totalorder %s255_s2, %s1198_s10  ;;  %p1202_p4 = scmp.lt.u32.totalorder %s1443_s29, %s1198_s10 }
 0x137   :  { %p1204_p7 = scmp.lt.u32.totalorder %s1198_s10, %s255_s2 }
 0x138   :  { %p1203_p1 = por %p1202_p4, %p1201_p3 }
 0x13a   :  { %p1205_p0 = por %p1204_p7, %p1203_p1 }
 0x13c   :  { %p1206_p8 = pnand %p1205_p0, %p1199_p5 }
 0x13e   :  { %1209 = shalt.err (!%p1206_p8)  }
 0x13f   :  { %s1210_s0 = scalar_lea.vmem %s1652_s20, 16  ;;  %p1215_p10 = scmp.lt.s32.totalorder %s1652_s20, %s1426_s14 }
 0x140   :  { %p1211_p9 = scmp.ne.s32.totalorder %s1652_s20, %s1210_s0  ;;  %p1216_p11 = scmp.lt.s32.totalorder %s1452_s7, %s1210_s0 }
 0x142   :  { %p1217_p12 = por %p1216_p11, %p1215_p10 }
 0x144   :  { %p1218_p13 = pnand %p1217_p12, %p1211_p9 }
 0x146   :  { %1221 = shalt.err (!%p1218_p13)  }
 0x147   :  { %268 = dma.hbm_to_vmem [thread:$0]  %s255_s2, 16, %s1652_s20, [#allocation3 + $0xb] }
 0x148   :  { %s1818_s17 = smov (!%p727_p6, %s271_s17), 999  ;;  %s1692_s5 = sld [smem:[#allocation5 + $0x85]] }
 0x149   :  { %s732_s22 = sshll.u32 %s1818_s17, 4  ;;  %s1371_s24 = smov [#allocation2 + $0xd]  }
 0x14a   :  { %s275_s23 = scalar_lea.hbm %s1777_s1, %s732_s22  ;;  %s305_s25 = sshll.u32 %s1371_s24, 4  ;;  %s306_s25 = int_to_ptr.vmem [resolvable:$true] %s305_s25 }
 0x14b   :  { %s1222_s15 = scalar_lea.hbm %s275_s23, 16  ;;  %p1225_p5 = scmp.lt.u32.totalorder %s275_s23, %s1777_s1 }
 0x14c   :  { %p1223_p2 = scmp.ne.s32.totalorder %s275_s23, %s1222_s15  ;;  %p1226_p3 = scmp.lt.u32.totalorder %s1443_s29, %s1222_s15 }
 0x14d   :  { %p1228_p1 = scmp.lt.u32.totalorder %s1222_s15, %s275_s23 }
 0x14e   :  { %p1227_p4 = por %p1226_p3, %p1225_p5 }
 0x150   :  { %p1229_p7 = por %p1228_p1, %p1227_p4 }
 0x152   :  { %p1230_p6 = pnand %p1229_p7, %p1223_p2 }
 0x154   :  { %1233 = shalt.err (!%p1230_p6)  }
 0x155   :  { %s1234_s20 = scalar_lea.vmem %s1678_s30, 16  ;;  %p1239_p8 = scmp.lt.s32.totalorder %s1678_s30, %s1426_s14 }
 0x156   :  { %p1235_p0 = scmp.ne.s32.totalorder %s1678_s30, %s1234_s20  ;;  %p1240_p9 = scmp.lt.s32.totalorder %s1452_s7, %s1234_s20 }
 0x158   :  { %p1241_p10 = por %p1240_p9, %p1239_p8 }
 0x15a   :  { %p1242_p11 = pnand %p1241_p10, %p1235_p0 }
 0x15c   :  { %1245 = shalt.err (!%p1242_p11)  }
 0x15d   :  { %288 = dma.hbm_to_vmem [thread:$0]  %s275_s23, 16, %s1678_s30, [#allocation3 + $0xc] }
 0x15e   :  { %s1707_s13 = sld [smem:[#allocation5 + $0x86]]  ;;  %s1372_s6 = smov [#allocation2 + $0xe]  }
 0x15f   :  { %s325_s21 = sshll.u32 %s1372_s6, 4  ;;  %s1709_s17 = sld [smem:[#allocation5 + $0x87]]  ;;  %s1714_s21 = int_to_ptr.vmem [resolvable:$true] %s325_s21 }
 0x160   :  { %p290_p12 = scmp.gt.s32.totalorder %s1692_s5, 0  ;;  %p734_p13 = scmp.lt.s32.totalorder %s1692_s5, 999 }
 0x161   :  { %s1373_s18 = smov [#allocation2 + $0xf]  }
 0x162   :  { %s1820_s5 = smov (!%p290_p12, %s1692_s5), 0  ;;  %s1716_s28 = sshll.u32 %s1373_s18, 4  ;;  %s1742_s28 = int_to_ptr.vmem [resolvable:$true] %s1716_s28 }
 0x163   :  { %s1822_s5 = smov (!%p734_p13, %s1820_s5), 999 }
 0x164   :  { %p310_p2 = scmp.gt.s32.totalorder %s1707_s13, 0  ;;  %s739_s30 = sshll.u32 %s1822_s5, 4 }
 0x165   :  { %p330_p3 = scmp.gt.s32.totalorder %s1709_s17, 0  ;;  %s295_s2 = scalar_lea.hbm %s1777_s1, %s739_s30 }
 0x166   :  { %s1246_s10 = scalar_lea.hbm %s295_s2, 16  ;;  %p1249_p7 = scmp.lt.u32.totalorder %s295_s2, %s1777_s1 }
 0x167   :  { %p1247_p1 = scmp.ne.s32.totalorder %s295_s2, %s1246_s10  ;;  %p1250_p6 = scmp.lt.u32.totalorder %s1443_s29, %s1246_s10 }
 0x168   :  { %p1252_p8 = scmp.lt.u32.totalorder %s1246_s10, %s295_s2 }
 0x169   :  { %p1251_p0 = por %p1250_p6, %p1249_p7 }
 0x16b   :  { %p1253_p9 = por %p1252_p8, %p1251_p0 }
 0x16d   :  { %p1254_p10 = pnand %p1253_p9, %p1247_p1 }
 0x16f   :  { %1257 = shalt.err (!%p1254_p10)  }
 0x170   :  { %s1258_s0 = scalar_lea.vmem %s306_s25, 16  ;;  %p1263_p12 = scmp.lt.s32.totalorder %s306_s25, %s1426_s14 }
 0x171   :  { %p1259_p11 = scmp.ne.s32.totalorder %s306_s25, %s1258_s0  ;;  %p1264_p13 = scmp.lt.s32.totalorder %s1452_s7, %s1258_s0 }
 0x173   :  { %p1265_p5 = por %p1264_p13, %p1263_p12 }
 0x175   :  { %p1266_p4 = pnand %p1265_p5, %p1259_p11 }
 0x177   :  { %1269 = shalt.err (!%p1266_p4)  }
 0x178   :  { %308 = dma.hbm_to_vmem [thread:$0]  %s295_s2, 16, %s306_s25, [#allocation3 + $0xd] }
 0x179   :  { %s311_s5 = scalar_select %p310_p2, %s1707_s13, 0 }
 0x17a   :  { %s331_s22 = scalar_select %p330_p3, %s1709_s17, 0 }
 0x17b   :  { %p1783_p1 = scmp.lt.s32.totalorder %s1707_s13, 999  ;;  %p1784_p7 = scmp.lt.s32.totalorder %s1709_s17, 999 }
 0x17d   :  { %s1824_s5 = smov (!%p1783_p1, %s311_s5), 999  ;;  %s1826_s22 = smov (!%p1784_p7, %s331_s22), 999 }
 0x17e   :  { %s746_s12 = sshll.u32 %s1824_s5, 4  ;;  %s753_s25 = sshll.u32 %s1826_s22, 4 }
 0x17f   :  { %s315_s24 = scalar_lea.hbm %s1777_s1, %s746_s12 }
 0x180   :  { %s1270_s15 = scalar_lea.hbm %s315_s24, 16  ;;  %p1273_p2 = scmp.lt.u32.totalorder %s315_s24, %s1777_s1 }
 0x181   :  { %p1271_p5 = scmp.ne.s32.totalorder %s315_s24, %s1270_s15  ;;  %p1274_p4 = scmp.lt.u32.totalorder %s1443_s29, %s1270_s15 }
 0x182   :  { %p1276_p6 = scmp.lt.u32.totalorder %s1270_s15, %s315_s24 }
 0x183   :  { %p1275_p3 = por %p1274_p4, %p1273_p2 }
 0x185   :  { %p1277_p0 = por %p1276_p6, %p1275_p3 }
 0x187   :  { %p1278_p8 = pnand %p1277_p0, %p1271_p5 }
 0x189   :  { %1281 = shalt.err (!%p1278_p8)  }
 0x18a   :  { %s1282_s20 = scalar_lea.vmem %s1714_s21, 16  ;;  %p1287_p10 = scmp.lt.s32.totalorder %s1714_s21, %s1426_s14 }
 0x18b   :  { %p1283_p9 = scmp.ne.s32.totalorder %s1714_s21, %s1282_s20  ;;  %p1288_p11 = scmp.lt.s32.totalorder %s1452_s7, %s1282_s20 }
 0x18d   :  { %p1289_p12 = por %p1288_p11, %p1287_p10 }
 0x18f   :  { %p1290_p13 = pnand %p1289_p12, %p1283_p9 }
 0x191   :  { %1293 = shalt.err (!%p1290_p13)  }
 0x192   :  { %328 = dma.hbm_to_vmem [thread:$0]  %s315_s24, 16, %s1714_s21, [#allocation3 + $0xe] }
 0x193   :  { %s335_s17 = scalar_lea.hbm %s1777_s1, %s753_s25 }
 0x194   :  { %s1294_s18 = scalar_lea.hbm %s335_s17, 16  ;;  %p1297_p7 = scmp.lt.u32.totalorder %s335_s17, %s1777_s1 }
 0x195   :  { %p1295_p1 = scmp.ne.s32.totalorder %s335_s17, %s1294_s18  ;;  %p1298_p5 = scmp.lt.u32.totalorder %s1443_s29, %s1294_s18 }
 0x196   :  { %p1300_p4 = scmp.lt.u32.totalorder %s1294_s18, %s335_s17 }
 0x197   :  { %p1299_p2 = por %p1298_p5, %p1297_p7 }
 0x199   :  { %p1301_p3 = por %p1300_p4, %p1299_p2 }
 0x19b   :  { %p1302_p6 = pnand %p1301_p3, %p1295_p1 }
 0x19d   :  { %1305 = shalt.err (!%p1302_p6)  }
 0x19e   :  { %s1306_s21 = scalar_lea.vmem %s1742_s28, 16  ;;  %p1311_p8 = scmp.lt.s32.totalorder %s1742_s28, %s1426_s14 }
 0x19f   :  { %p1307_p0 = scmp.ne.s32.totalorder %s1742_s28, %s1306_s21  ;;  %p1312_p9 = scmp.lt.s32.totalorder %s1452_s7, %s1306_s21 }
 0x1a1   :  { %p1313_p10 = por %p1312_p9, %p1311_p8 }
 0x1a3   :  { %p1314_p11 = pnand %p1313_p10, %p1307_p0 }
 0x1a5   :  { %1317 = shalt.err (!%p1314_p11)  }
 0x1a6   :  { %348 = dma.hbm_to_vmem [thread:$0]  %s335_s17, 16, %s1742_s28, [#allocation3 + $0xf] }
 0x1a7   :  { %1322 = dma.done.wait [#allocation3], 16 }
 0x1a8   :  { %1323 = vsyncadd [#allocation3], 4294967280 }
 0x1a9   :  { %1324 = dma.done.wait [#allocation3 + $0x1], 16 }
 0x1aa   :  { %1325 = vsyncadd [#allocation3 + $0x1], 4294967280 }
 0x1ab   :  { %1326 = dma.done.wait [#allocation3 + $0x2], 16 }
 0x1ac   :  { %1327 = vsyncadd [#allocation3 + $0x2], 4294967280 }
 0x1ad   :  { %1328 = dma.done.wait [#allocation3 + $0x3], 16 }
 0x1ae   :  { %1329 = vsyncadd [#allocation3 + $0x3], 4294967280 }
 0x1af   :  { %1330 = dma.done.wait [#allocation3 + $0x4], 16 }
 0x1b0   :  { %1331 = vsyncadd [#allocation3 + $0x4], 4294967280 }
 0x1b1   :  { %1332 = dma.done.wait [#allocation3 + $0x5], 16 }
 0x1b2   :  { %1333 = vsyncadd [#allocation3 + $0x5], 4294967280 }
 0x1b3   :  { %1334 = dma.done.wait [#allocation3 + $0x6], 16 }
 0x1b4   :  { %1335 = vsyncadd [#allocation3 + $0x6], 4294967280 }
 0x1b5   :  { %1336 = dma.done.wait [#allocation3 + $0x7], 16 }
 0x1b6   :  { %1337 = vsyncadd [#allocation3 + $0x7], 4294967280 }
 0x1b7   :  { %1338 = dma.done.wait [#allocation3 + $0x8], 16 }
 0x1b8   :  { %1339 = vsyncadd [#allocation3 + $0x8], 4294967280 }
 0x1b9   :  { %1340 = dma.done.wait [#allocation3 + $0x9], 16 }
 0x1ba   :  { %1341 = vsyncadd [#allocation3 + $0x9], 4294967280 }
 0x1bb   :  { %1342 = dma.done.wait [#allocation3 + $0xa], 16 }
 0x1bc   :  { %1343 = vsyncadd [#allocation3 + $0xa], 4294967280 }
 0x1bd   :  { %1344 = dma.done.wait [#allocation3 + $0xb], 16 }
 0x1be   :  { %1345 = vsyncadd [#allocation3 + $0xb], 4294967280 }
 0x1bf   :  { %1346 = dma.done.wait [#allocation3 + $0xc], 16 }
 0x1c0   :  { %1347 = vsyncadd [#allocation3 + $0xc], 4294967280 }
 0x1c1   :  { %1348 = dma.done.wait [#allocation3 + $0xd], 16 }
 0x1c2   :  { %1349 = vsyncadd [#allocation3 + $0xd], 4294967280 }
 0x1c3   :  { %1350 = dma.done.wait [#allocation3 + $0xe], 16 }
 0x1c4   :  { %1351 = vsyncadd [#allocation3 + $0xe], 4294967280 }
 0x1c5   :  { %1352 = dma.done.wait [#allocation3 + $0xf], 16 }
 0x1c6   :  { %1353 = vsyncadd [#allocation3 + $0xf], 4294967280  ;;  %v1374_v0 = vmov 0.0|0.0   ;;  %vm1375_vm0 = vmmov 0   ;;  %v1376_v1 = vmov 0.0   ;;  %v401_v2 = vld [vmem:[#allocation6] sm:$0xff] }
 0x1c7   :  { %855 = vmatprep.subr.bf16.mxu0 %v1374_v0  ;;  %852 = vmatprep.mubr.msk.f32.mxu0 %vm1375_vm0, %v1376_v1  ;;  %v402_v3 = vld [vmem:[#allocation6 + $0x8] sm:$0xff]  ;;  %v403_v4 = vld [vmem:[#allocation6 + $0x10] sm:$0xff]  ;;  %v404_v6 = vld [vmem:[#allocation6 + $0x18] sm:$0xff]  ;;  %vm396_vm1 = vcmask 1040384   ;;  %vm398_vm2 = vcmask 1041408  }
 0x1c8   :  { %v856_v5 = vpack.c.bf16 %v402_v3, %v401_v2  ;;  %v859_v7 = vpack.c.bf16 %v404_v6, %v403_v4  ;;  %v405_v8 = vld [vmem:[#allocation6 + $0x20] sm:$0xff]  ;;  %v406_v9 = vld [vmem:[#allocation6 + $0x28] sm:$0xff]  ;;  %v382_v10 = vld [vmem:[#allocation2] sm:$0xff] }
 0x1c9   :  { %v389_v11 = vld [vmem:[#allocation2 + $0x8] sm:$0xff]  ;;  %v383_v12 = vrot.slane %v382_v10, 4  ;;  %v862_v14 = vpack.c.bf16 %v406_v9, %v405_v8  ;;  %v407_v15 = vld [vmem:[#allocation6 + $0x30] sm:$0xff]  ;;  %v409_v22 = vld [vmem:[#allocation6 + $0x40] sm:$0xff] }
 0x1ca   :  { %857 = vmatpush3.bf16.msra.mxu0 %v856_v5  ;;  %v390_v13 = vrot.slane %v389_v11, 4  ;;  %v408_v16 = vld [vmem:[#allocation6 + $0x38] sm:$0xff]  ;;  %v410_v23 = vld [vmem:[#allocation6 + $0x48] sm:$0xff]  ;;  %v411_v27 = vld [vmem:[#allocation6 + $0x50] sm:$0xff] }
 0x1cb   :  { %858 = vmatprep.subr.bf16.mxu0 %v1374_v0  ;;  %v384_v17 = vadd.f32 %v383_v12, %v382_v10  ;;  %v865_v21 = vpack.c.bf16 %v408_v16, %v407_v15  ;;  %v868_v26 = vpack.c.bf16 %v410_v23, %v409_v22  ;;  %v412_v28 = vld [vmem:[#allocation6 + $0x58] sm:$0xff]  ;;  %v413_v32 = vld [vmem:[#allocation6 + $0x60] sm:$0xff]  ;;  %v414_v33 = vld [vmem:[#allocation6 + $0x68] sm:$0xff] }
 0x1cc   :  { %v391_v18 = vadd.f32 %v390_v13, %v389_v11  ;;  %v871_v31 = vpack.c.bf16 %v412_v28, %v411_v27  ;;  %v874_v36 = vpack.c.bf16 %v414_v33, %v413_v32  ;;  %v415_v37 = vld [vmem:[#allocation6 + $0x70] sm:$0xff]  ;;  %v416_v38 = vld [vmem:[#allocation6 + $0x78] sm:$0xff]  ;;  %v754_v43 = vld [vmem:[%s1779_s3] ss:$0 sm:$0xff] }
 0x1cd   :  { %v385_v19 = vrot.slane %v384_v17, 2  ;;  %v877_v40 = vpack.c.bf16 %v416_v38, %v415_v37 }
 0x1ce   :  { %860 = vmatpush3.bf16.msra.mxu0 %v859_v7  ;;  %v392_v20 = vrot.slane %v391_v18, 2 }
 0x1cf   :  { %861 = vmatprep.subr.bf16.mxu0 %v1374_v0  ;;  %v386_v24 = vadd.f32 %v385_v19, %v384_v17 }
 0x1d0   :  { %v393_v25 = vadd.f32 %v392_v20, %v391_v18 }
 0x1d1   :  { %v387_v29 = vrot.slane %v386_v24, 1 }
 0x1d2   :  { %863 = vmatpush3.bf16.msra.mxu0 %v862_v14  ;;  %v394_v30 = vrot.slane %v393_v25, 1 }
 0x1d3   :  { %864 = vmatprep.subr.bf16.mxu0 %v1374_v0  ;;  %v388_v34 = vadd.f32 %v387_v29, %v386_v24 }
 0x1d4   :  { %v395_v35 = vadd.f32 %v394_v30, %v393_v25 }
 0x1d6   :  { %866 = vmatpush3.bf16.msra.mxu0 %v865_v21  ;;  %v397_v39 = vsel %vm396_vm1, %v388_v34, %v395_v35 }
 0x1d7   :  { %867 = vmatprep.subr.bf16.mxu0 %v1374_v0  ;;  %v399_v41 = vsel %vm398_vm2, %v397_v39, 0.0 }
 0x1d8   :  { %v400_v42 = vmul.f32 0.125, %v399_v41 }
 0x1da   :  { %869 = vmatpush3.bf16.msra.mxu0 %v868_v26 }
 0x1db   :  { %870 = vmatprep.subr.bf16.mxu0 %v1374_v0 }
 0x1de   :  { %872 = vmatpush3.bf16.msra.mxu0 %v871_v31 }
 0x1df   :  { %873 = vmatprep.subr.bf16.mxu0 %v1374_v0 }
 0x1e2   :  { %875 = vmatpush3.bf16.msra.mxu0 %v874_v36 }
 0x1e3   :  { %876 = vmatprep.subr.bf16.mxu0 %v1374_v0 }
 0x1e6   :  { %878 = vmatpush3.bf16.msra.mxu0 %v877_v40 }
 0x1e9   :  { %853 = vmatmul.mubr.f32.vlgmr.msra.gmra.mrb[0].mxu0 %v400_v42 }
 0x2bc   :  { %v490_v44 = vpop.f32.mrb[0].mxu0 }
 0x2bd   :  { %v491_v45 = vadd.f32 %v754_v43, %v490_v44  ;;  %v854_v46 = vpop.f32.mrb[1].mxu0 }
 0x2bf   :  { %494 = vst [vmem:[%s1780_s4] sm:$0xff] %v491_v45 }
 0x2c0   :  { %499 = vsyncpa [#allocation7], 1 }
 0x2c1   :  { %500 = vsyncmov [#allocation3] }
 0x2c4   :  { %s501_s28 = vpop.sfrf %500 }
 0x2c5   :  { %p755_p12 = scmp.ne.s32.totalorder %s501_s28, 0 }
 0x2c7   :  { %505 = shalt.err (%p755_p12)  }
 0x2c8   :  { %507 = vsyncmov [#allocation3 + $0x1] }
 0x2cb   :  { %s508_s9 = vpop.sfrf %507 }
 0x2cc   :  { %p756_p13 = scmp.ne.s32.totalorder %s508_s9, 0 }
 0x2ce   :  { %512 = shalt.err (%p756_p13)  }
 0x2cf   :  { %514 = vsyncmov [#allocation3 + $0x2] }
 0x2d2   :  { %s515_s2 = vpop.sfrf %514 }
 0x2d3   :  { %p757_p1 = scmp.ne.s32.totalorder %s515_s2, 0 }
 0x2d5   :  { %519 = shalt.err (%p757_p1)  }
 0x2d6   :  { %521 = vsyncmov [#allocation3 + $0x3] }
 0x2d9   :  { %s522_s3 = vpop.sfrf %521 }
 0x2da   :  { %p758_p7 = scmp.ne.s32.totalorder %s522_s3, 0 }
 0x2dc   :  { %526 = shalt.err (%p758_p7)  }
 0x2dd   :  { %528 = vsyncmov [#allocation3 + $0x4] }
 0x2e0   :  { %s529_s10 = vpop.sfrf %528 }
 0x2e1   :  { %p759_p5 = scmp.ne.s32.totalorder %s529_s10, 0 }
 0x2e3   :  { %533 = shalt.err (%p759_p5)  }
 0x2e4   :  { %535 = vsyncmov [#allocation3 + $0x5] }
 0x2e7   :  { %s536_s4 = vpop.sfrf %535 }
 0x2e8   :  { %p760_p2 = scmp.ne.s32.totalorder %s536_s4, 0 }
 0x2ea   :  { %540 = shalt.err (%p760_p2)  }
 0x2eb   :  { %542 = vsyncmov [#allocation3 + $0x6] }
 0x2ee   :  { %s543_s11 = vpop.sfrf %542 }
 0x2ef   :  { %p761_p4 = scmp.ne.s32.totalorder %s543_s11, 0 }
 0x2f1   :  { %547 = shalt.err (%p761_p4)  }
 0x2f2   :  { %549 = vsyncmov [#allocation3 + $0x7] }
 0x2f5   :  { %s550_s19 = vpop.sfrf %549 }
 0x2f6   :  { %p762_p3 = scmp.ne.s32.totalorder %s550_s19, 0 }
 0x2f8   :  { %554 = shalt.err (%p762_p3)  }
 0x2f9   :  { %556 = vsyncmov [#allocation3 + $0x8] }
 0x2fc   :  { %s557_s0 = vpop.sfrf %556 }
 0x2fd   :  { %p763_p6 = scmp.ne.s32.totalorder %s557_s0, 0 }
 0x2ff   :  { %561 = shalt.err (%p763_p6)  }
 0x300   :  { %563 = vsyncmov [#allocation3 + $0x9] }
 0x303   :  { %s564_s5 = vpop.sfrf %563 }
 0x304   :  { %p764_p0 = scmp.ne.s32.totalorder %s564_s5, 0 }
 0x306   :  { %568 = shalt.err (%p764_p0)  }
 0x307   :  { %570 = vsyncmov [#allocation3 + $0xa] }
 0x30a   :  { %s571_s22 = vpop.sfrf %570 }
 0x30b   :  { %p765_p8 = scmp.ne.s32.totalorder %s571_s22, 0 }
 0x30d   :  { %575 = shalt.err (%p765_p8)  }
 0x30e   :  { %577 = vsyncmov [#allocation3 + $0xb] }
 0x311   :  { %s578_s12 = vpop.sfrf %577 }
 0x312   :  { %p766_p9 = scmp.ne.s32.totalorder %s578_s12, 0 }
 0x314   :  { %582 = shalt.err (%p766_p9)  }
 0x315   :  { %584 = vsyncmov [#allocation3 + $0xc] }
 0x318   :  { %s585_s16 = vpop.sfrf %584 }
 0x319   :  { %p767_p10 = scmp.ne.s32.totalorder %s585_s16, 0 }
 0x31b   :  { %589 = shalt.err (%p767_p10)  }
 0x31c   :  { %591 = vsyncmov [#allocation3 + $0xd] }
 0x31f   :  { %s592_s23 = vpop.sfrf %591 }
 0x320   :  { %p768_p11 = scmp.ne.s32.totalorder %s592_s23, 0 }
 0x322   :  { %596 = shalt.err (%p768_p11)  }
 0x323   :  { %598 = vsyncmov [#allocation3 + $0xe] }
 0x326   :  { %s599_s24 = vpop.sfrf %598 }
 0x327   :  { %p769_p12 = scmp.ne.s32.totalorder %s599_s24, 0 }
 0x329   :  { %603 = shalt.err (%p769_p12)  }
 0x32a   :  { %605 = vsyncmov [#allocation3 + $0xf] }
 0x32d   :  { %s606_s25 = vpop.sfrf %605 }
 0x32e   :  { %p770_p13 = scmp.ne.s32.totalorder %s606_s25, 0 }
 0x330   :  { %610 = shalt.err (%p770_p13)  }

</bundles_post_ra>
